<compile_context>
chip_gen: v5e
topology: v5e:2x2
jax: 0.10.0
libtpu: 0.0.40
codegen_flags: <defaults>
</compile_context>

<pallas_src>
import math
from functools import partial

import jax
import jax.numpy as jnp
from jax import lax
from jax.experimental import pallas as pl
from jax.experimental.pallas import tpu as pltpu


def _round_up(x, m):
    return (x + m - 1) // m * m


# ----------------------------- Pallas kernel --------------------------------
def _make_infonce_kernel(T_max):
    """T_max = duration - min_context_size (step-0 subset length), static."""

    def kernel(log_denom_ref, e_ref, c_ref, w_ref, out_ref):
        # log_denom_ref: (S,) f32 in SMEM  -- log(B * T_s) per step
        # e_ref: (B, T_e,  De)  embeddings window, VMEM-resident across the grid
        # c_ref: (B, T_pad, Dc) contexts   window, VMEM-resident across the grid
        # w_ref: (1, De, Dc)    this step's bilinear weight (pipelined per step)
        # out_ref: (1, B, T_pad) lane-dense per-position loss slab
        B, T_pad, Dc = c_ref.shape
        De = e_ref.shape[-1]

        s = pl.program_id(0)
        t_valid = T_max - s                      # this step's subset duration T_s

        # Per-step operands: only the weight block changes; e is shifted by `s`
        # along time via a dynamic slice of the resident window.
        e = e_ref[:, pl.ds(s, T_pad), :]         # (B, T_pad, De), native dtype
        c = c_ref[...]                           # (B, T_pad, Dc), native dtype
        w = w_ref[0]                             # (De, Dc),       native dtype

        # MXU: project contexts through the bilinear weight.
        #   p[b, t, i] = sum_j c[b, t, j] * w[i, j]
        p = lax.dot_general(
            c.reshape(B * T_pad, Dc), w,
            dimension_numbers=(((1,), (1,)), ((), ())),
            preferred_element_type=jnp.float32,
        ).reshape(B, T_pad, De)                  # f32

        e32 = e.astype(jnp.float32)

        # positive[a, t] = e[a, t] . W . c[a, t]   (matching-batch dot, no masks)
        positive = jnp.sum(e32 * p, axis=-1)     # (B, T_pad)

        # alt[a, b, t] = e[a, t] . W . c[b, t]  -- unrolled over the (small)
        # context-batch axis; peak intermediate stays at (B, T_pad, De).
        cols = [jnp.sum(e32 * p[b][None, :, :], axis=-1) for b in range(B)]

        # Stable logsumexp over the alternative-batch axis.
        m = cols[0]
        for b in range(1, B):
            m = jnp.maximum(m, cols[b])
        sumexp = jnp.zeros_like(m)
        for col in cols:
            sumexp = sumexp + jnp.exp(col - m)
        lse = m + jnp.log(sumexp) - log_denom_ref[s]    # logsumexp - log(B*T_s)

        loss = lse - positive                    # = -(positive - shifted lse)

        # Zero the padded / invalid time tail and store one full lane-dense block.
        t_idx = lax.broadcasted_iota(jnp.int32, (B, T_pad), 1)
        loss = jnp.where(t_idx < t_valid, loss, 0.0)
        out_ref[0] = loss

    return kernel


# ------------------------------ wrapper --------------------------------------
def infonce_loss(embeddings, contexts, weights,
                 min_context_size=64, future_steps=12):
    """JAX/Pallas equivalent of InfoNCELoss.forward (bias-free bilinear comparator)."""
    if embeddings.ndim != 3 or contexts.ndim != 3:
        raise ValueError("Expected (batch, time, dim) inputs")
    if embeddings.shape[:2] != contexts.shape[:2]:
        raise ValueError("Embeddings and contexts shape mismatch")
    B, duration, De = embeddings.shape
    Dc = contexts.shape[-1]
    M, S = min_context_size, future_steps
    if duration < M + S:
        raise ValueError("Duration is not enough for InfoNCE loss")

    T_max = duration - M                       # step-0 subset duration
    T_pad = _round_up(T_max, 128)              # lane-dense compute/store width
    T_e = _round_up(T_pad + S - 1, 8)          # e window incl. per-step shift

    # Shared, overlapping windows -> DMA'd once, VMEM-resident across the grid.
    e_win = embeddings[:, M:duration, :]
    e_pad = jnp.pad(e_win, ((0, 0), (0, T_e - T_max), (0, 0)))
    c_win = contexts[:, M - 1:duration - 1, :]
    c_pad = jnp.pad(c_win, ((0, 0), (0, T_pad - T_max), (0, 0)))

    if isinstance(weights, (list, tuple)):
        w_stack = jnp.stack(list(weights), axis=0)          # (S, De, Dc)
    else:
        w_stack = weights

    steps = jnp.arange(S, dtype=jnp.int32)
    log_denoms = jnp.log((B * (T_max - steps)).astype(jnp.float32))   # (S,)

    kernel = _make_infonce_kernel(T_max)
    out = pl.pallas_call(
        kernel,
        out_shape=jax.ShapeDtypeStruct((S, B, T_pad), jnp.float32),
        grid=(S,),
        in_specs=[
            # tiny per-step scalar table lives in SMEM, passed whole
            pl.BlockSpec(memory_space=pltpu.MemorySpace.SMEM),
            # constant index_map -> fetched once, kept resident across the grid
            pl.BlockSpec((B, T_e, De), lambda s: (0, 0, 0)),
            pl.BlockSpec((B, T_pad, Dc), lambda s: (0, 0, 0)),
            # only the per-step weight block changes (double-buffered by Pallas)
            pl.BlockSpec((1, De, Dc), lambda s: (s, 0, 0)),
        ],
        out_specs=pl.BlockSpec((1, B, T_pad), lambda s: (s, 0, 0)),
        compiler_params=pltpu.CompilerParams(
            dimension_semantics=("parallel",),        # steps independent (2 TCs on v7x)
            vmem_limit_bytes=32 * 1024 * 1024),
    )(log_denoms, e_pad, c_pad, w_stack)

    # Flatten exactly like the PyTorch module: per step, (B, T_s) row-major.
    flat = []
    for step in range(S):
        T_s = T_max - step
        flat.append(out[step, :, :T_s].reshape(-1))
    return jnp.concatenate(flat, axis=0)


# -------------------------- pure-JAX reference --------------------------------
def _ref_loss(embeddings, contexts, weights, min_context_size=64, future_steps=12):
    B, duration = embeddings.shape[:2]
    flat = []
    for step in range(future_steps):
        e = embeddings[:, min_context_size + step:duration]
        c = contexts[:, min_context_size - 1:duration - step - 1]
        T = e.shape[1]
        scores = jnp.einsum('ati,ij,bsj->atbs', e, weights[step], c)  # (B,T,B,T)
        positive = jnp.diagonal(scores.reshape(B * T, B * T)).reshape(B, T)
        alt = jnp.diagonal(scores, axis1=1, axis2=3)                   # (B, B, T)
        lse = jax.nn.logsumexp(alt, axis=1) - jnp.log(jnp.float32(B * T))
        flat.append((-(positive - lse)).reshape(-1))
    return jnp.concatenate(flat, axis=0)


# --------------------------------- main ---------------------------------------
if __name__ == "__main__":
    B = 2
    duration = 80          # >= min_context_size (64) + future_steps (12)
    emb_dim = 32
    ctx_dim = 32
    min_context_size = 64
    future_steps = 12

    key = jax.random.PRNGKey(0)
    k_e, k_c, k_w = jax.random.split(key, 3)

    embeddings = jax.random.normal(k_e, (B, duration, emb_dim), jnp.float32)
    contexts = jax.random.normal(k_c, (B, duration, ctx_dim), jnp.float32)

    # Deterministic per-step comparator weights (emb_dim, ctx_dim).
    weights = [
        jax.random.normal(jax.random.fold_in(k_w, s), (emb_dim, ctx_dim),
                          jnp.float32) * (1.0 / math.sqrt(emb_dim))
        for s in range(future_steps)
    ]

    loss_fn = jax.jit(partial(infonce_loss,
                              min_context_size=min_context_size,
                              future_steps=future_steps))
    losses = jax.block_until_ready(loss_fn(embeddings, contexts, weights))

    ref = jax.block_until_ready(_ref_loss(embeddings, contexts, weights,
                                          min_context_size=min_context_size,
                                          future_steps=future_steps))

    expected_len = B * sum(duration - min_context_size - s
                           for s in range(future_steps))
    assert losses.shape == (expected_len,), losses.shape
    assert jnp.allclose(losses, ref, rtol=1e-4, atol=1e-4), (
        float(jnp.max(jnp.abs(losses - ref))))

    print("KERNEL_OK")
</pallas_src>

<mosaic_0001>
module attributes {stable_mosaic.version = 11 : i64} {
  func.func @kernel(%arg0: i32, %arg1: memref<12xf32, #tpu.memory_space<smem>>, %arg2: memref<2x144x32xf32, #tpu.memory_space<vmem>>, %arg3: memref<2x128x32xf32, #tpu.memory_space<vmem>>, %arg4: memref<1x32x32xf32, #tpu.memory_space<vmem>>, %arg5: memref<1x2x128xf32, #tpu.memory_space<vmem>>) attributes {dimension_semantics = [#tpu.dimension_semantics<parallel>], iteration_bounds = array<i64: 12>, scalar_prefetch = 0 : i64, scratch_operands = 0 : i64, tpu.core_type = #tpu.core_type<tc>, window_params = [{transform_indices = @transform_0, window_bounds = array<i64: 12>}, {pipeline_mode = #tpu.pipeline_mode<synchronous>, transform_indices = @transform_1, window_bounds = array<i64: 2, 144, 32>}, {pipeline_mode = #tpu.pipeline_mode<synchronous>, transform_indices = @transform_2, window_bounds = array<i64: 2, 128, 32>}, {transform_indices = @transform_3, window_bounds = array<i64: 1, 32, 32>}, {transform_indices = @transform_4, window_bounds = array<i64: 1, 2, 128>}]} {
    %c16_i32 = arith.constant 16 : i32
    %0 = arith.subi %c16_i32, %arg0 : i32
    %c0 = arith.constant 0 : index
    %1 = arith.index_cast %arg0 : i32 to index
    %c0_0 = arith.constant 0 : index
    %2 = vector.load %arg2[%c0, %1, %c0_0] : memref<2x144x32xf32, #tpu.memory_space<vmem>>, vector<2x128x32xf32>
    %c0_1 = arith.constant 0 : index
    %c0_2 = arith.constant 0 : index
    %c0_3 = arith.constant 0 : index
    %3 = vector.load %arg3[%c0_1, %c0_2, %c0_3] : memref<2x128x32xf32, #tpu.memory_space<vmem>>, vector<2x128x32xf32>
    %c0_4 = arith.constant 0 : index
    %c0_5 = arith.constant 0 : index
    %c0_6 = arith.constant 0 : index
    %4 = vector.load %arg4[%c0_4, %c0_5, %c0_6] : memref<1x32x32xf32, #tpu.memory_space<vmem>>, vector<1x32x32xf32>
    %5 = vector.shape_cast %4 : vector<1x32x32xf32> to vector<32x32xf32>
    %6 = vector.shape_cast %3 : vector<2x128x32xf32> to vector<256x32xf32>
    %cst = arith.constant dense<0.000000e+00> : vector<256x32xf32>
    %7 = tpu.matmul %6, %5, %cst {dimension_numbers = #tpu.dot_dimension_numbers<[1], [1], [0], [0], [0, 0, 1, 0], [], []>} : vector<256x32xf32>, vector<32x32xf32>, vector<256x32xf32> -> vector<256x32xf32>
    %8 = vector.shape_cast %7 : vector<256x32xf32> to vector<2x128x32xf32>
    %9 = arith.mulf %2, %8 : vector<2x128x32xf32>
    %cst_7 = arith.constant dense<0.000000e+00> : vector<2x128xf32>
    %10 = vector.multi_reduction <add>, %9, %cst_7 [2] : vector<2x128x32xf32> to vector<2x128xf32>
    %11 = vector.extract_strided_slice %8 {offsets = [0, 0, 0], sizes = [1, 128, 32], strides = [1, 1, 1]} : vector<2x128x32xf32> to vector<1x128x32xf32>
    %12 = vector.shape_cast %11 : vector<1x128x32xf32> to vector<128x32xf32>
    %13 = vector.shape_cast %12 : vector<128x32xf32> to vector<1x128x32xf32>
    %14 = vector.broadcast %13 : vector<1x128x32xf32> to vector<2x128x32xf32>
    %15 = arith.mulf %2, %14 : vector<2x128x32xf32>
    %cst_8 = arith.constant dense<0.000000e+00> : vector<2x128xf32>
    %16 = vector.multi_reduction <add>, %15, %cst_8 [2] : vector<2x128x32xf32> to vector<2x128xf32>
    %17 = vector.extract_strided_slice %8 {offsets = [1, 0, 0], sizes = [1, 128, 32], strides = [1, 1, 1]} : vector<2x128x32xf32> to vector<1x128x32xf32>
    %18 = vector.shape_cast %17 : vector<1x128x32xf32> to vector<128x32xf32>
    %19 = vector.shape_cast %18 : vector<128x32xf32> to vector<1x128x32xf32>
    %20 = vector.broadcast %19 : vector<1x128x32xf32> to vector<2x128x32xf32>
    %21 = arith.mulf %2, %20 : vector<2x128x32xf32>
    %cst_9 = arith.constant dense<0.000000e+00> : vector<2x128xf32>
    %22 = vector.multi_reduction <add>, %21, %cst_9 [2] : vector<2x128x32xf32> to vector<2x128xf32>
    %23 = arith.maximumf %16, %22 : vector<2x128xf32>
    %cst_10 = arith.constant 0.000000e+00 : f32
    %24 = vector.broadcast %cst_10 : f32 to vector<2x128xf32>
    %25 = arith.subf %16, %23 : vector<2x128xf32>
    %26 = math.exp %25 : vector<2x128xf32>
    %27 = arith.addf %24, %26 : vector<2x128xf32>
    %28 = arith.subf %22, %23 : vector<2x128xf32>
    %29 = math.exp %28 : vector<2x128xf32>
    %30 = arith.addf %27, %29 : vector<2x128xf32>
    %31 = math.log %30 : vector<2x128xf32>
    %32 = arith.addf %23, %31 : vector<2x128xf32>
    %33 = arith.index_cast %arg0 : i32 to index
    %34 = memref.load %arg1[%33] : memref<12xf32, #tpu.memory_space<smem>>
    %35 = vector.broadcast %34 : f32 to vector<2x128xf32>
    %36 = arith.subf %32, %35 : vector<2x128xf32>
    %37 = arith.subf %36, %10 : vector<2x128xf32>
    %38 = tpu.iota {dimensions = array<i32: 1>} : vector<2x128xi32>
    %39 = vector.broadcast %0 : i32 to vector<2x128xi32>
    %40 = arith.cmpi slt, %38, %39 : vector<2x128xi32>
    %cst_11 = arith.constant 0.000000e+00 : f32
    %41 = vector.broadcast %cst_11 : f32 to vector<2x128xf32>
    %42 = arith.select %40, %37, %41 : vector<2x128xi1>, vector<2x128xf32>
    %c0_12 = arith.constant 0 : index
    %c0_13 = arith.constant 0 : index
    %c0_14 = arith.constant 0 : index
    %43 = vector.load %arg5[%c0_12, %c0_13, %c0_14] : memref<1x2x128xf32, #tpu.memory_space<vmem>>, vector<1x2x128xf32>
    %44 = vector.shape_cast %43 : vector<1x2x128xf32> to vector<2x128xf32>
    %45 = vector.shape_cast %42 : vector<2x128xf32> to vector<1x2x128xf32>
    tpu.vector_store %arg5[%c0_12, %c0_13, %c0_14], %45 {strides = array<i32>} : memref<1x2x128xf32, #tpu.memory_space<vmem>>, vector<1x2x128xf32>,
    return
  }
  func.func @transform_0(%arg0: i32) -> i32 {
    %c0_i32 = arith.constant 0 : i32
    %c0_i32_0 = arith.constant 0 : i32
    return %c0_i32 : i32
  }
  func.func @transform_1(%arg0: i32) -> (i32, i32, i32) {
    %c0_i32 = arith.constant 0 : i32
    %c0_i32_0 = arith.constant 0 : i32
    %c0_i32_1 = arith.constant 0 : i32
    %c0_i32_2 = arith.constant 0 : i32
    return %c0_i32, %c0_i32_0, %c0_i32_1 : i32, i32, i32
  }
  func.func @transform_2(%arg0: i32) -> (i32, i32, i32) {
    %c0_i32 = arith.constant 0 : i32
    %c0_i32_0 = arith.constant 0 : i32
    %c0_i32_1 = arith.constant 0 : i32
    %c0_i32_2 = arith.constant 0 : i32
    return %c0_i32, %c0_i32_0, %c0_i32_1 : i32, i32, i32
  }
  func.func @transform_3(%arg0: i32) -> (i32, i32, i32) {
    %c0_i32 = arith.constant 0 : i32
    %c0_i32_0 = arith.constant 0 : i32
    %c0_i32_1 = arith.constant 0 : i32
    return %arg0, %c0_i32, %c0_i32_0 : i32, i32, i32
  }
  func.func @transform_4(%arg0: i32) -> (i32, i32, i32) {
    %c0_i32 = arith.constant 0 : i32
    %c0_i32_0 = arith.constant 0 : i32
    %c0_i32_1 = arith.constant 0 : i32
    return %arg0, %c0_i32, %c0_i32_0 : i32, i32, i32
  }
}

</mosaic_0001>

<bundles_post_ra>
// kernel: squeeze.12
= control target key start
LH: loop header
LB: loop body
LE: loop exit
PB: predicated region body
PF: predicated region fallthrough
CT: control target
= control target key end

     0   :  { %vm7_vm0 = vcmask 130048   ;;  %vm13_vm1 = vcmask 261248   ;;  %s39_s0 = inlined_call_operand.vmem [shape: f32[1,2,16], index: 0, kind: input, shape index: {}]   ;;  %s40_s1 = inlined_call_operand.vmem [shape: f32[32], index: 1, kind: output, shape index: {}]  }
   0x1   :  { %v4_v0 = vld [vmem:[%s39_s0] sm:$0x3]  ;;  %s22_s0 = smov 16  }
   0x2   :  { %5 = vst [vmem:[#allocation1] sm:$0x3] %v4_v0 }
   0x9   :  { %v10_v1 = vld [vmem:[#allocation1 + $0x1] sm:$0x1]   ;;  %v6_v2 = vld [vmem:[#allocation1] sm:$0x1]  }
   0xa   :  { %11 = vrot.lane.b32.xlu0 %v10_v1, %s22_s0  ;;  %8 = vst.msk [vmem:[#allocation0] sm:$0x1] %vm7_vm0, %v6_v2  }
  0x7c   :  { %v12_v3 = vpop.permute.xlu0 %11  }
  0x7d   :  { %14 = vst.msk [vmem:[#allocation0] sm:$0x1] %vm13_vm1, %v12_v3  }
  0x84   :  { %v17_v4 = vld [vmem:[#allocation0] sm:$0x1] }
  0x85   :  { %20 = vst [vmem:[%s40_s1] sm:$0x1] %v17_v4 }

// kernel: squeeze.13
= control target key start
LH: loop header
LB: loop body
LE: loop exit
PB: predicated region body
PF: predicated region fallthrough
CT: control target
= control target key end

     0   :  { %vm7_vm0 = vcmask 121856   ;;  %vm13_vm1 = vcmask 244856   ;;  %s39_s0 = inlined_call_operand.vmem [shape: f32[1,2,15], index: 0, kind: input, shape index: {}]   ;;  %s40_s1 = inlined_call_operand.vmem [shape: f32[30], index: 1, kind: output, shape index: {}]  }
   0x1   :  { %v4_v0 = vld [vmem:[%s39_s0] sm:$0x3]  ;;  %s22_s0 = smov 15  }
   0x2   :  { %5 = vst [vmem:[#allocation1] sm:$0x3] %v4_v0 }
   0x9   :  { %v10_v1 = vld [vmem:[#allocation1 + $0x1] sm:$0x1]   ;;  %v6_v2 = vld [vmem:[#allocation1] sm:$0x1]  }
   0xa   :  { %11 = vrot.lane.b32.xlu0 %v10_v1, %s22_s0  ;;  %8 = vst.msk [vmem:[#allocation0] sm:$0x1] %vm7_vm0, %v6_v2  }
  0x7c   :  { %v12_v3 = vpop.permute.xlu0 %11  }
  0x7d   :  { %14 = vst.msk [vmem:[#allocation0] sm:$0x1] %vm13_vm1, %v12_v3  }
  0x84   :  { %v17_v4 = vld [vmem:[#allocation0] sm:$0x1] }
  0x85   :  { %20 = vst [vmem:[%s40_s1] sm:$0x1] %v17_v4 }

// kernel: squeeze.14
= control target key start
LH: loop header
LB: loop body
LE: loop exit
PB: predicated region body
PF: predicated region fallthrough
CT: control target
= control target key end

     0   :  { %vm7_vm0 = vcmask 113664   ;;  %vm13_vm1 = vcmask 228464   ;;  %s39_s0 = inlined_call_operand.vmem [shape: f32[1,2,14], index: 0, kind: input, shape index: {}]   ;;  %s40_s1 = inlined_call_operand.vmem [shape: f32[28], index: 1, kind: output, shape index: {}]  }
   0x1   :  { %v4_v0 = vld [vmem:[%s39_s0] sm:$0x3]  ;;  %s22_s0 = smov 14  }
   0x2   :  { %5 = vst [vmem:[#allocation1] sm:$0x3] %v4_v0 }
   0x9   :  { %v10_v1 = vld [vmem:[#allocation1 + $0x1] sm:$0x1]   ;;  %v6_v2 = vld [vmem:[#allocation1] sm:$0x1]  }
   0xa   :  { %11 = vrot.lane.b32.xlu0 %v10_v1, %s22_s0  ;;  %8 = vst.msk [vmem:[#allocation0] sm:$0x1] %vm7_vm0, %v6_v2  }
  0x7c   :  { %v12_v3 = vpop.permute.xlu0 %11  }
  0x7d   :  { %14 = vst.msk [vmem:[#allocation0] sm:$0x1] %vm13_vm1, %v12_v3  }
  0x84   :  { %v17_v4 = vld [vmem:[#allocation0] sm:$0x1] }
  0x85   :  { %20 = vst [vmem:[%s40_s1] sm:$0x1] %v17_v4 }

// kernel: squeeze.15
= control target key start
LH: loop header
LB: loop body
LE: loop exit
PB: predicated region body
PF: predicated region fallthrough
CT: control target
= control target key end

     0   :  { %vm7_vm0 = vcmask 105472   ;;  %vm13_vm1 = vcmask 212072   ;;  %s39_s0 = inlined_call_operand.vmem [shape: f32[1,2,13], index: 0, kind: input, shape index: {}]   ;;  %s40_s1 = inlined_call_operand.vmem [shape: f32[26], index: 1, kind: output, shape index: {}]  }
   0x1   :  { %v4_v0 = vld [vmem:[%s39_s0] sm:$0x3]  ;;  %s22_s0 = smov 13  }
   0x2   :  { %5 = vst [vmem:[#allocation1] sm:$0x3] %v4_v0 }
   0x9   :  { %v10_v1 = vld [vmem:[#allocation1 + $0x1] sm:$0x1]   ;;  %v6_v2 = vld [vmem:[#allocation1] sm:$0x1]  }
   0xa   :  { %11 = vrot.lane.b32.xlu0 %v10_v1, %s22_s0  ;;  %8 = vst.msk [vmem:[#allocation0] sm:$0x1] %vm7_vm0, %v6_v2  }
  0x7c   :  { %v12_v3 = vpop.permute.xlu0 %11  }
  0x7d   :  { %14 = vst.msk [vmem:[#allocation0] sm:$0x1] %vm13_vm1, %v12_v3  }
  0x84   :  { %v17_v4 = vld [vmem:[#allocation0] sm:$0x1] }
  0x85   :  { %20 = vst [vmem:[%s40_s1] sm:$0x1] %v17_v4 }

// kernel: squeeze.16
= control target key start
LH: loop header
LB: loop body
LE: loop exit
PB: predicated region body
PF: predicated region fallthrough
CT: control target
= control target key end

     0   :  { %vm7_vm0 = vcmask 97280   ;;  %vm13_vm1 = vcmask 195680   ;;  %s39_s0 = inlined_call_operand.vmem [shape: f32[1,2,12], index: 0, kind: input, shape index: {}]   ;;  %s40_s1 = inlined_call_operand.vmem [shape: f32[24], index: 1, kind: output, shape index: {}]  }
   0x1   :  { %v4_v0 = vld [vmem:[%s39_s0] sm:$0x3]  ;;  %s22_s0 = smov 12  }
   0x2   :  { %5 = vst [vmem:[#allocation1] sm:$0x3] %v4_v0 }
   0x9   :  { %v10_v1 = vld [vmem:[#allocation1 + $0x1] sm:$0x1]   ;;  %v6_v2 = vld [vmem:[#allocation1] sm:$0x1]  }
   0xa   :  { %11 = vrot.lane.b32.xlu0 %v10_v1, %s22_s0  ;;  %8 = vst.msk [vmem:[#allocation0] sm:$0x1] %vm7_vm0, %v6_v2  }
  0x7c   :  { %v12_v3 = vpop.permute.xlu0 %11  }
  0x7d   :  { %14 = vst.msk [vmem:[#allocation0] sm:$0x1] %vm13_vm1, %v12_v3  }
  0x84   :  { %v17_v4 = vld [vmem:[#allocation0] sm:$0x1] }
  0x85   :  { %20 = vst [vmem:[%s40_s1] sm:$0x1] %v17_v4 }

// kernel: squeeze.17
= control target key start
LH: loop header
LB: loop body
LE: loop exit
PB: predicated region body
PF: predicated region fallthrough
CT: control target
= control target key end

     0   :  { %vm7_vm0 = vcmask 89088   ;;  %vm13_vm1 = vcmask 179288   ;;  %s39_s0 = inlined_call_operand.vmem [shape: f32[1,2,11], index: 0, kind: input, shape index: {}]   ;;  %s40_s1 = inlined_call_operand.vmem [shape: f32[22], index: 1, kind: output, shape index: {}]  }
   0x1   :  { %v4_v0 = vld [vmem:[%s39_s0] sm:$0x3]  ;;  %s22_s0 = smov 11  }
   0x2   :  { %5 = vst [vmem:[#allocation1] sm:$0x3] %v4_v0 }
   0x9   :  { %v10_v1 = vld [vmem:[#allocation1 + $0x1] sm:$0x1]   ;;  %v6_v2 = vld [vmem:[#allocation1] sm:$0x1]  }
   0xa   :  { %11 = vrot.lane.b32.xlu0 %v10_v1, %s22_s0  ;;  %8 = vst.msk [vmem:[#allocation0] sm:$0x1] %vm7_vm0, %v6_v2  }
  0x7c   :  { %v12_v3 = vpop.permute.xlu0 %11  }
  0x7d   :  { %14 = vst.msk [vmem:[#allocation0] sm:$0x1] %vm13_vm1, %v12_v3  }
  0x84   :  { %v17_v4 = vld [vmem:[#allocation0] sm:$0x1] }
  0x85   :  { %20 = vst [vmem:[%s40_s1] sm:$0x1] %v17_v4 }

// kernel: squeeze.18
= control target key start
LH: loop header
LB: loop body
LE: loop exit
PB: predicated region body
PF: predicated region fallthrough
CT: control target
= control target key end

     0   :  { %vm7_vm0 = vcmask 80896   ;;  %vm13_vm1 = vcmask 162896   ;;  %s39_s0 = inlined_call_operand.vmem [shape: f32[1,2,10], index: 0, kind: input, shape index: {}]   ;;  %s40_s1 = inlined_call_operand.vmem [shape: f32[20], index: 1, kind: output, shape index: {}]  }
   0x1   :  { %v4_v0 = vld [vmem:[%s39_s0] sm:$0x3]  ;;  %s22_s0 = smov 10  }
   0x2   :  { %5 = vst [vmem:[#allocation1] sm:$0x3] %v4_v0 }
   0x9   :  { %v10_v1 = vld [vmem:[#allocation1 + $0x1] sm:$0x1]   ;;  %v6_v2 = vld [vmem:[#allocation1] sm:$0x1]  }
   0xa   :  { %11 = vrot.lane.b32.xlu0 %v10_v1, %s22_s0  ;;  %8 = vst.msk [vmem:[#allocation0] sm:$0x1] %vm7_vm0, %v6_v2  }
  0x7c   :  { %v12_v3 = vpop.permute.xlu0 %11  }
  0x7d   :  { %14 = vst.msk [vmem:[#allocation0] sm:$0x1] %vm13_vm1, %v12_v3  }
  0x84   :  { %v17_v4 = vld [vmem:[#allocation0] sm:$0x1] }
  0x85   :  { %20 = vst [vmem:[%s40_s1] sm:$0x1] %v17_v4 }

// kernel: squeeze.19
= control target key start
LH: loop header
LB: loop body
LE: loop exit
PB: predicated region body
PF: predicated region fallthrough
CT: control target
= control target key end

     0   :  { %vm7_vm0 = vcmask 72704   ;;  %vm13_vm1 = vcmask 146504   ;;  %s39_s0 = inlined_call_operand.vmem [shape: f32[1,2,9], index: 0, kind: input, shape index: {}]   ;;  %s40_s1 = inlined_call_operand.vmem [shape: f32[18], index: 1, kind: output, shape index: {}]  }
   0x1   :  { %v4_v0 = vld [vmem:[%s39_s0] sm:$0x3]  ;;  %s22_s0 = smov 9  }
   0x2   :  { %5 = vst [vmem:[#allocation1] sm:$0x3] %v4_v0 }
   0x9   :  { %v10_v1 = vld [vmem:[#allocation1 + $0x1] sm:$0x1]   ;;  %v6_v2 = vld [vmem:[#allocation1] sm:$0x1]  }
   0xa   :  { %11 = vrot.lane.b32.xlu0 %v10_v1, %s22_s0  ;;  %8 = vst.msk [vmem:[#allocation0] sm:$0x1] %vm7_vm0, %v6_v2  }
  0x7c   :  { %v12_v3 = vpop.permute.xlu0 %11  }
  0x7d   :  { %14 = vst.msk [vmem:[#allocation0] sm:$0x1] %vm13_vm1, %v12_v3  }
  0x84   :  { %v17_v4 = vld [vmem:[#allocation0] sm:$0x1] }
  0x85   :  { %20 = vst [vmem:[%s40_s1] sm:$0x1] %v17_v4 }

// kernel: squeeze.20
= control target key start
LH: loop header
LB: loop body
LE: loop exit
PB: predicated region body
PF: predicated region fallthrough
CT: control target
= control target key end

     0   :  { %vm7_vm0 = vcmask 64512   ;;  %vm13_vm1 = vcmask 130112   ;;  %s39_s0 = inlined_call_operand.vmem [shape: f32[1,2,8], index: 0, kind: input, shape index: {}]   ;;  %s40_s1 = inlined_call_operand.vmem [shape: f32[16], index: 1, kind: output, shape index: {}]  }
   0x1   :  { %v4_v0 = vld [vmem:[%s39_s0] sm:$0x3]  ;;  %s22_s0 = smov 8  }
   0x2   :  { %5 = vst [vmem:[#allocation1] sm:$0x3] %v4_v0 }
   0x9   :  { %v10_v1 = vld [vmem:[#allocation1 + $0x1] sm:$0x1]   ;;  %v6_v2 = vld [vmem:[#allocation1] sm:$0x1]  }
   0xa   :  { %11 = vrot.lane.b32.xlu0 %v10_v1, %s22_s0  ;;  %8 = vst.msk [vmem:[#allocation0] sm:$0x1] %vm7_vm0, %v6_v2  }
  0x7c   :  { %v12_v3 = vpop.permute.xlu0 %11  }
  0x7d   :  { %14 = vst.msk [vmem:[#allocation0] sm:$0x1] %vm13_vm1, %v12_v3  }
  0x84   :  { %v17_v4 = vld [vmem:[#allocation0] sm:$0x1] }
  0x85   :  { %20 = vst [vmem:[%s40_s1] sm:$0x1] %v17_v4 }

// kernel: squeeze.21
= control target key start
LH: loop header
LB: loop body
LE: loop exit
PB: predicated region body
PF: predicated region fallthrough
CT: control target
= control target key end

     0   :  { %vm7_vm0 = vcmask 56320   ;;  %vm13_vm1 = vcmask 113720   ;;  %s39_s0 = inlined_call_operand.vmem [shape: f32[1,2,7], index: 0, kind: input, shape index: {}]   ;;  %s40_s1 = inlined_call_operand.vmem [shape: f32[14], index: 1, kind: output, shape index: {}]  }
   0x1   :  { %v4_v0 = vld [vmem:[%s39_s0] sm:$0x3]  ;;  %s22_s0 = smov 7  }
   0x2   :  { %5 = vst [vmem:[#allocation1] sm:$0x3] %v4_v0 }
   0x9   :  { %v10_v1 = vld [vmem:[#allocation1 + $0x1] sm:$0x1]   ;;  %v6_v2 = vld [vmem:[#allocation1] sm:$0x1]  }
   0xa   :  { %11 = vrot.lane.b32.xlu0 %v10_v1, %s22_s0  ;;  %8 = vst.msk [vmem:[#allocation0] sm:$0x1] %vm7_vm0, %v6_v2  }
  0x7c   :  { %v12_v3 = vpop.permute.xlu0 %11  }
  0x7d   :  { %14 = vst.msk [vmem:[#allocation0] sm:$0x1] %vm13_vm1, %v12_v3  }
  0x84   :  { %v17_v4 = vld [vmem:[#allocation0] sm:$0x1] }
  0x85   :  { %20 = vst [vmem:[%s40_s1] sm:$0x1] %v17_v4 }

// kernel: squeeze.23
= control target key start
LH: loop header
LB: loop body
LE: loop exit
PB: predicated region body
PF: predicated region fallthrough
CT: control target
= control target key end

     0   :  { %vm7_vm0 = vcmask 39936   ;;  %vm13_vm1 = vcmask 80936   ;;  %s39_s0 = inlined_call_operand.vmem [shape: f32[1,2,5], index: 0, kind: input, shape index: {}]   ;;  %s40_s1 = inlined_call_operand.vmem [shape: f32[10], index: 1, kind: output, shape index: {}]  }
   0x1   :  { %v4_v0 = vld [vmem:[%s39_s0] sm:$0x3]  ;;  %s22_s0 = smov 5  }
   0x2   :  { %5 = vst [vmem:[#allocation1] sm:$0x3] %v4_v0 }
   0x9   :  { %v10_v1 = vld [vmem:[#allocation1 + $0x1] sm:$0x1]   ;;  %v6_v2 = vld [vmem:[#allocation1] sm:$0x1]  }
   0xa   :  { %11 = vrot.lane.b32.xlu0 %v10_v1, %s22_s0  ;;  %8 = vst.msk [vmem:[#allocation0] sm:$0x1] %vm7_vm0, %v6_v2  }
  0x7c   :  { %v12_v3 = vpop.permute.xlu0 %11  }
  0x7d   :  { %14 = vst.msk [vmem:[#allocation0] sm:$0x1] %vm13_vm1, %v12_v3  }
  0x84   :  { %v17_v4 = vld [vmem:[#allocation0] sm:$0x1] }
  0x85   :  { %20 = vst [vmem:[%s40_s1] sm:$0x1] %v17_v4 }

// kernel: squeeze.22
= control target key start
LH: loop header
LB: loop body
LE: loop exit
PB: predicated region body
PF: predicated region fallthrough
CT: control target
= control target key end

     0   :  { %vm7_vm0 = vcmask 48128   ;;  %vm13_vm1 = vcmask 97328   ;;  %s39_s0 = inlined_call_operand.vmem [shape: f32[1,2,6], index: 0, kind: input, shape index: {}]   ;;  %s40_s1 = inlined_call_operand.vmem [shape: f32[12], index: 1, kind: output, shape index: {}]  }
   0x1   :  { %v4_v0 = vld [vmem:[%s39_s0] sm:$0x3]  ;;  %s22_s0 = smov 6  }
   0x2   :  { %5 = vst [vmem:[#allocation1] sm:$0x3] %v4_v0 }
   0x9   :  { %v10_v1 = vld [vmem:[#allocation1 + $0x1] sm:$0x1]   ;;  %v6_v2 = vld [vmem:[#allocation1] sm:$0x1]  }
   0xa   :  { %11 = vrot.lane.b32.xlu0 %v10_v1, %s22_s0  ;;  %8 = vst.msk [vmem:[#allocation0] sm:$0x1] %vm7_vm0, %v6_v2  }
  0x7c   :  { %v12_v3 = vpop.permute.xlu0 %11  }
  0x7d   :  { %14 = vst.msk [vmem:[#allocation0] sm:$0x1] %vm13_vm1, %v12_v3  }
  0x84   :  { %v17_v4 = vld [vmem:[#allocation0] sm:$0x1] }
  0x85   :  { %20 = vst [vmem:[%s40_s1] sm:$0x1] %v17_v4 }

// kernel: infonce_loss.1
= control target key start
LH: loop header
LB: loop body
LE: loop exit
PB: predicated region body
PF: predicated region fallthrough
CT: control target
= control target key end

     0   :  { %9 = vsyncpa [#allocation3], 0  ;;  %s1732_s15 = smov 0   ;;  %s2546_s0 = inlined_call_operand.vmem [shape: f32[12], index: 0, kind: input, shape index: {}]   ;;  %s2547_s1 = inlined_call_operand.vmem [shape: f32[2,144,32], index: 1, kind: input, shape index: {}]   ;;  %s2548_s2 = inlined_call_operand.vmem [shape: f32[2,128,32], index: 2, kind: input, shape index: {}]   ;;  %s2549_s3 = inlined_call_operand.vmem [shape: f32[12,32,32], index: 3, kind: input, shape index: {}]   ;;  %s2550_s4 = inlined_call_operand.vmem [shape: f32[12,2,128], index: 4, kind: output, shape index: {}]  }
   0x1 LB: > { %s1738_s16 = sadd.s32 4294967295, %s1704_s15   ;;  %p1409_p0 = scmp.ge.s32.totalorder %s1704_s15, 1  ;;  %s1704_s15 = sphi %s1732_s15, %s15_s15  }
   0x2   : > { %p135_p1 = scmp.lt.s32.totalorder %s1704_s15, 13  ;;  %s147_s19 = sshll.u32 %s2546_s0, 4  ;;  %s148_s19 = int_to_ptr.vmem [resolvable:$true] %s147_s19 }
   0x3   : > { %p1476_p3 = scmp.eq.s32.totalorder %s1738_s16, 0  ;;  %s1706_s20 = smov [#allocation2]  }
   0x4   : > { %p136_p2 = pnand %p1409_p0, %p135_p1 }
   0x6   : > { %p1472_p4 = pneg %p136_p2  ;;  %174 = sbr.rel (%p136_p2) target bundleno = 488 (0x1e8), region = 36 }
   0x8   : > { %p1473_p5 = pnand %p1476_p3, %p1472_p4 }
   0xa   : > { %1475 = dma.vmem_to_smem (!%p1473_p5), %s148_s19, 16, %s1706_s20, [#allocation3]  }
   0xb   : > { %1699 = dma.done.wait (%p1476_p3), [#allocation3], 16  }
   0xc   : > { %1701 = vsyncadd (%p1476_p3), [#allocation3], 4294967280 }
   0xd   : > { %181 = sfence }
   0xe   : > { %p201_p6 = scmp.lt.s32.totalorder %s1738_s16, 11  ;;  %vm280_vm0 = vcmask 261120   ;;  %v244_v4 = vld [vmem:[%s2548_s2] sm:$0xff]  ;;  %v245_v8 = vld [vmem:[%s2548_s2 + $0x8] sm:$0xff]  ;;  %v246_v12 = vld [vmem:[%s2548_s2 + $0x10] sm:$0xff]  ;;  %s1894_s18 = scalar_lea.vmem %s2547_s1, %s1738_s16  ;;  %vm1247_vm1 = vcmask 130112  }
   0xf   : > { %v252_v5 = vld [vmem:[%s2548_s2 + $0x40] sm:$0xff]  ;;  %v253_v9 = vld [vmem:[%s2548_s2 + $0x48] sm:$0xff]  ;;  %v254_v13 = vld [vmem:[%s2548_s2 + $0x50] sm:$0xff]  ;;  %s2036_s24 = sld [smem:[#allocation2 + %s1738_s16]]  ;;  %vm1251_vm2 = vcmask 195712   ;;  %vm1255_vm3 = vcmask 261312  }
  0x10   : > { %s1748_s21 = scalar_select %p201_p6, %s1738_s16, 11  ;;  %v260_v6 = vld [vmem:[%s2548_s2 + $0x80] sm:$0xff]  ;;  %v269_v10 = vld [vmem:[%s2548_s2 + $0xc8] sm:$0xff]  ;;  %v270_v14 = vld [vmem:[%s2548_s2 + $0xd0] sm:$0xff]  ;;  %vm1259_vm4 = vcmask 326912   ;;  %vm1263_vm5 = vcmask 392512  }
  0x11   : > { %v268_v7 = vld [vmem:[%s2548_s2 + $0xc0] sm:$0xff]  ;;  %v261_v11 = vld [vmem:[%s2548_s2 + $0x88] sm:$0xff]  ;;  %v262_v15 = vld [vmem:[%s2548_s2 + $0x90] sm:$0xff]  ;;  %vm1267_vm6 = vcmask 458112   ;;  %vm1271_vm7 = vcmask 523712   ;;  %vm1275_vm8 = vcmask 589312  }
  0x12   : > { %s1455_s22 = sshll.u32 %s1748_s21, 5  ;;  %v255_v16 = vld [vmem:[%s2548_s2 + $0x58] sm:$0xff]  ;;  %v248_v20 = vld [vmem:[%s2548_s2 + $0x20] sm:$0xff]  ;;  %v249_v24 = vld [vmem:[%s2548_s2 + $0x28] sm:$0xff]  ;;  %vm1279_vm9 = vcmask 654912   ;;  %vm1283_vm10 = vcmask 720512  }
  0x13   : > { %s205_s25 = scalar_lea.vmem %s2549_s3, %s1455_s22  ;;  %v247_v17 = vld [vmem:[%s2548_s2 + $0x18] sm:$0xff]  ;;  %v256_v21 = vld [vmem:[%s2548_s2 + $0x60] sm:$0xff]  ;;  %v257_v25 = vld [vmem:[%s2548_s2 + $0x68] sm:$0xff]  ;;  %vm1287_vm11 = vcmask 786112   ;;  %vm1291_vm12 = vcmask 851712   ;;  %vm1295_vm13 = vcmask 917312  }
  0x14   : > { %v279_v0 = vld [vmem:[%s205_s25 + $0x18] sm:$0xff]  ;;  %v278_v1 = vld [vmem:[%s205_s25 + $0x10] sm:$0xff]  ;;  %v277_v2 = vld [vmem:[%s205_s25 + $0x8] sm:$0xff]  ;;  %vm1299_vm14 = vcmask 982912   ;;  %s1416_s26 = sshll.u32 %s1748_s21, 1  ;;  %vm1303_vm15 = vcmask 1048512  }
  0x15   : > { %1417 = vmatpush.xpose.msk.msra.mxu0 %vm280_vm0, %v279_v0  ;;  %1456 = vmatpush.xpose.msk.msra.mxu1 %vm280_vm0, %v279_v0  ;;  %v276_v3 = vld [vmem:[%s205_s25] sm:$0xff]  ;;  %v263_v18 = vld [vmem:[%s2548_s2 + $0x98] sm:$0xff]  ;;  %v273_v26 = vld [vmem:[%s2548_s2 + $0xe8] sm:$0xff]  ;;  %s210_s25 = ssub.s32 16, %s1738_s16  ;;  %s209_s16 = scalar_lea.vmem %s2550_s4, %s1416_s26 }
  0x16   : > { %1457 = vmatpush.xpose.msk.msra.mxu2 %vm280_vm0, %v279_v0  ;;  %1458 = vmatpush.xpose.msk.msra.mxu3 %vm280_vm0, %v279_v0  ;;  %v271_v19 = vld [vmem:[%s2548_s2 + $0xd8] sm:$0xff]  ;;  %v264_v22 = vld [vmem:[%s2548_s2 + $0xa0] sm:$0xff]  ;;  %v265_v27 = vld [vmem:[%s2548_s2 + $0xa8] sm:$0xff] }
  0x17   : > { %v272_v23 = vld [vmem:[%s2548_s2 + $0xe0] sm:$0xff]  ;;  %v250_v28 = vld [vmem:[%s2548_s2 + $0x30] sm:$0xff]  ;;  %v267_v31 = vld [vmem:[%s2548_s2 + $0xb8] sm:$0xff] }
  0x18   : > { %v258_v29 = vld [vmem:[%s2548_s2 + $0x70] sm:$0xff]  ;;  %v251_v33 = vld [vmem:[%s2548_s2 + $0x38] sm:$0xff]  ;;  %v220_v35 = vld [vmem:[%s1894_s18 + $0x40] sm:$0xff] }
  0x19   : > { %1418 = vmatpush.xpose.msk.msra.mxu0 %vm280_vm0, %v278_v1  ;;  %1459 = vmatpush.xpose.msk.msra.mxu1 %vm280_vm0, %v278_v1  ;;  %v266_v30 = vld [vmem:[%s2548_s2 + $0xb0] sm:$0xff]  ;;  %v275_v34 = vld [vmem:[%s2548_s2 + $0xf8] sm:$0xff]  ;;  %v212_v36 = vld [vmem:[%s1894_s18] sm:$0xff] }
  0x1a   : > { %1460 = vmatpush.xpose.msk.msra.mxu2 %vm280_vm0, %v278_v1  ;;  %1461 = vmatpush.xpose.msk.msra.mxu3 %vm280_vm0, %v278_v1  ;;  %v274_v32 = vld [vmem:[%s2548_s2 + $0xf0] sm:$0xff]  ;;  %v259_v44 = vld [vmem:[%s2548_s2 + $0x78] sm:$0xff]  ;;  %v213_v62 = vld [vmem:[%s1894_s18 + $0x8] sm:$0xff] }
  0x1b   : > { %v236_v41 = vld [vmem:[%s1894_s18 + $0xd0] sm:$0xff]  ;;  %v237_v60 = vld [vmem:[%s1894_s18 + $0xd8] sm:$0xff] }
  0x1c   : > { %v228_v45 = vld [vmem:[%s1894_s18 + $0x90] sm:$0xff] }
  0x1d   : > { %1419 = vmatpush.xpose.msk.msra.mxu0 %vm280_vm0, %v277_v2  ;;  %1462 = vmatpush.xpose.msk.msra.mxu1 %vm280_vm0, %v277_v2 }
  0x1e   : > { %1463 = vmatpush.xpose.msk.msra.mxu2 %vm280_vm0, %v277_v2  ;;  %1464 = vmatpush.xpose.msk.msra.mxu3 %vm280_vm0, %v277_v2 }
  0x21   : > { %1420 = vmatpush.xpose.msk.msra.mxu0 %vm280_vm0, %v276_v3  ;;  %1465 = vmatpush.xpose.msk.msra.mxu1 %vm280_vm0, %v276_v3 }
  0x22   : > { %1466 = vmatpush.xpose.msk.msra.mxu2 %vm280_vm0, %v276_v3  ;;  %1467 = vmatpush.xpose.msk.msra.mxu3 %vm280_vm0, %v276_v3 }
  0x24   : > { %1421 = vmatmul.msk.f32.vlgmr.msra.gmra.mxu0 %vm280_vm0, %v244_v4  ;;  %1429 = vmatmul.msk.f32.vlgmr.msra.gmra.mxu1 %vm280_vm0, %v252_v5 }
  0x25   : > { %1437 = vmatmul.msk.f32.vlgmr.msra.gmra.mxu2 %vm280_vm0, %v260_v6  ;;  %1445 = vmatmul.msk.f32.vlgmr.msra.gmra.mxu3 %vm280_vm0, %v268_v7  ;;  %v214_v7 = vld [vmem:[%s1894_s18 + $0x10] sm:$0xff] }
  0x2c   : > { %1422 = vmatmul.msk.f32.gmra.mxu0 %vm280_vm0, %v245_v8  ;;  %1430 = vmatmul.msk.f32.gmra.mxu1 %vm280_vm0, %v253_v9 }
  0x2d   : > { %1446 = vmatmul.msk.f32.gmra.mxu3 %vm280_vm0, %v269_v10  ;;  %1438 = vmatmul.msk.f32.gmra.mxu2 %vm280_vm0, %v261_v11  ;;  %v229_v10 = vld [vmem:[%s1894_s18 + $0x98] sm:$0xff]  ;;  %v221_v11 = vld [vmem:[%s1894_s18 + $0x48] sm:$0xff] }
  0x34   : > { %1423 = vmatmul.msk.f32.gmra.mxu0 %vm280_vm0, %v246_v12  ;;  %1431 = vmatmul.msk.f32.gmra.mxu1 %vm280_vm0, %v254_v13 }
  0x35   : > { %1447 = vmatmul.msk.f32.gmra.mxu3 %vm280_vm0, %v270_v14  ;;  %1439 = vmatmul.msk.f32.gmra.mxu2 %vm280_vm0, %v262_v15 }
  0x3c   : > { %1432 = vmatmul.msk.f32.gmra.mxu1 %vm280_vm0, %v255_v16  ;;  %1424 = vmatmul.msk.f32.gmra.mxu0 %vm280_vm0, %v247_v17 }
  0x3d   : > { %1440 = vmatmul.msk.f32.gmra.mxu2 %vm280_vm0, %v263_v18  ;;  %1448 = vmatmul.msk.f32.gmra.mxu3 %vm280_vm0, %v271_v19  ;;  %v222_v18 = vld [vmem:[%s1894_s18 + $0x50] sm:$0xff] }
  0x44   : > { %1425 = vmatmul.msk.f32.gmra.mxu0 %vm280_vm0, %v248_v20  ;;  %1433 = vmatmul.msk.f32.gmra.mxu1 %vm280_vm0, %v256_v21  ;;  %v238_v20 = vld [vmem:[%s1894_s18 + $0xe0] sm:$0xff] }
  0x45   : > { %1441 = vmatmul.msk.f32.gmra.mxu2 %vm280_vm0, %v264_v22  ;;  %1449 = vmatmul.msk.f32.gmra.mxu3 %vm280_vm0, %v272_v23 }
  0x4c   : > { %1426 = vmatmul.msk.f32.gmra.mxu0 %vm280_vm0, %v249_v24  ;;  %1434 = vmatmul.msk.f32.gmra.mxu1 %vm280_vm0, %v257_v25 }
  0x4d   : > { %1450 = vmatmul.msk.f32.gmra.mxu3 %vm280_vm0, %v273_v26  ;;  %1442 = vmatmul.msk.f32.gmra.mxu2 %vm280_vm0, %v265_v27  ;;  %v230_v27 = vld [vmem:[%s1894_s18 + $0xa0] sm:$0xff] }
  0x54   : > { %1427 = vmatmul.msk.f32.gmra.mxu0 %vm280_vm0, %v250_v28  ;;  %1435 = vmatmul.msk.f32.gmra.mxu1 %vm280_vm0, %v258_v29 }
  0x55   : > { %1443 = vmatmul.msk.f32.gmra.mxu2 %vm280_vm0, %v266_v30  ;;  %1451 = vmatmul.msk.f32.gmra.mxu3 %vm280_vm0, %v274_v32 }
  0x5c   : > { %1428 = vmatmul.msk.f32.gmra.mxu0 %vm280_vm0, %v251_v33  ;;  %1436 = vmatmul.msk.f32.gmra.mxu1 %vm280_vm0, %v259_v44  ;;  %v231_v44 = vld [vmem:[%s1894_s18 + $0xa8] sm:$0xff] }
  0x5d   : > { %1444 = vmatmul.msk.f32.gmra.mxu2 %vm280_vm0, %v267_v31  ;;  %1452 = vmatmul.msk.f32.gmra.mxu3 %vm280_vm0, %v275_v34  ;;  %v223_v34 = vld [vmem:[%s1894_s18 + $0x58] sm:$0xff] }
  0xa1   : > { %v406_v37 = vpop.f32.mrf.mxu0  ;;  %v430_v38 = vpop.f32.mrf.mxu1 }
  0xa2   : > { %v510_v39 = vmul.f32 %v430_v38, %v220_v35  ;;  %v502_v40 = vmul.f32 %v406_v37, %v212_v36  ;;  %v638_v46 = vmul.f32 %v430_v38, %v236_v41  ;;  %v630_v47 = vmul.f32 %v406_v37, %v228_v45 }
  0xa4   : > { %v558_v42 = vsel %vm280_vm0, %v510_v39, 0.0  ;;  %v534_v43 = vsel %vm280_vm0, %v502_v40, 0.0  ;;  %v670_v51 = vsel %vm280_vm0, %v638_v46, 0.0  ;;  %v646_v53 = vsel %vm280_vm0, %v630_v47, 0.0 }
  0xa5   : > { %559 = vadd.xlane.f32.xlu2 %v558_v42  ;;  %535 = vadd.xlane.f32.xlu0 %v534_v43 }
  0xa8   : > { %v454_v48 = vpop.f32.mrf.mxu2  ;;  %v478_v49 = vpop.f32.mrf.mxu3 }
  0xa9   : > { %v518_v50 = vmul.f32 %v454_v48, %v228_v45  ;;  %v702_v54 = vmul.f32 %v478_v49, %v220_v35  ;;  %v526_v55 = vmul.f32 %v478_v49, %v236_v41  ;;  %v694_v56 = vmul.f32 %v454_v48, %v212_v36  ;;  %v409_v57 = vpop.f32.mrf.mxu0  ;;  %v433_v63 = vpop.f32.mrf.mxu1 }
  0xaa   : > { %v503_v2 = vmul.f32 %v409_v57, %v213_v62  ;;  %v639_v3 = vmul.f32 %v433_v63, %v237_v60  ;;  %v511_v13 = vmul.f32 %v433_v63, %v221_v11  ;;  %v631_v24 = vmul.f32 %v409_v57, %v229_v10 }
  0xab   : > { %v582_v52 = vsel %vm280_vm0, %v518_v50, 0.0  ;;  %v734_v58 = vsel %vm280_vm0, %v702_v54, 0.0  ;;  %v606_v59 = vsel %vm280_vm0, %v526_v55, 0.0  ;;  %v710_v0 = vsel %vm280_vm0, %v694_v56, 0.0  ;;  %v215_v50 = vld [vmem:[%s1894_s18 + $0x18] sm:$0xff]  ;;  %v239_v55 = vld [vmem:[%s1894_s18 + $0xe8] sm:$0xff] }
  0xac   : > { %583 = vadd.xlane.f32.xlu1 %v582_v52  ;;  %v673_v5 = vsel %vm280_vm0, %v639_v3, 0.0  ;;  %v537_v6 = vsel %vm280_vm0, %v503_v2, 0.0  ;;  %v561_v17 = vsel %vm280_vm0, %v511_v13, 0.0  ;;  %v649_v28 = vsel %vm280_vm0, %v631_v24, 0.0 }
  0xad   : > { %647 = vadd.xlane.f32.xlu2 %v646_v53  ;;  %671 = vadd.xlane.f32.xlu0 %v670_v51  ;;  %v216_v53 = vld [vmem:[%s1894_s18 + $0x20] sm:$0xff] }
  0xb0   : > { %v481_v61 = vpop.f32.mrf.mxu3  ;;  %v457_v9 = vpop.f32.mrf.mxu2 }
  0xb1   : > { %v527_v1 = vmul.f32 %v481_v61, %v237_v60  ;;  %v412_v8 = vpop.f32.mrf.mxu0  ;;  %v519_v14 = vmul.f32 %v457_v9, %v229_v10  ;;  %v436_v19 = vpop.f32.mrf.mxu1  ;;  %v695_v31 = vmul.f32 %v457_v9, %v213_v62  ;;  %v703_v39 = vmul.f32 %v481_v61, %v221_v11  ;;  %v240_v62 = vld [vmem:[%s1894_s18 + $0xf0] sm:$0xff] }
  0xb2   : > { %v504_v12 = vmul.f32 %v412_v8, %v214_v7  ;;  %v512_v22 = vmul.f32 %v436_v19, %v222_v18  ;;  %v632_v30 = vmul.f32 %v412_v8, %v230_v27  ;;  %v640_v38 = vmul.f32 %v436_v19, %v238_v20  ;;  %v232_v9 = vld [vmem:[%s1894_s18 + $0xb0] sm:$0xff] }
  0xb3   : > { %v609_v4 = vsel %vm280_vm0, %v527_v1, 0.0  ;;  %v585_v16 = vsel %vm280_vm0, %v519_v14, 0.0  ;;  %v713_v36 = vsel %vm280_vm0, %v695_v31, 0.0  ;;  %v737_v45 = vsel %vm280_vm0, %v703_v39, 0.0 }
  0xb4   : > { %735 = vadd.xlane.f32.xlu1 %v734_v58  ;;  %v540_v15 = vsel %vm280_vm0, %v504_v12, 0.0  ;;  %v564_v25 = vsel %vm280_vm0, %v512_v22, 0.0  ;;  %v652_v33 = vsel %vm280_vm0, %v632_v30, 0.0  ;;  %v676_v43 = vsel %vm280_vm0, %v640_v38, 0.0 }
  0xb5   : > { %711 = vadd.xlane.f32.xlu2 %v710_v0  ;;  %607 = vadd.xlane.f32.xlu0 %v606_v59 }
  0xb8   : > { %v484_v21 = vpop.f32.mrf.mxu3  ;;  %v460_v42 = vpop.f32.mrf.mxu2 }
  0xb9   : > { %v528_v23 = vmul.f32 %v484_v21, %v238_v20  ;;  %v704_v29 = vmul.f32 %v484_v21, %v222_v18  ;;  %v439_v35 = vpop.f32.mrf.mxu1  ;;  %v415_v40 = vpop.f32.mrf.mxu0  ;;  %v696_v46 = vmul.f32 %v460_v42, %v214_v7  ;;  %v520_v47 = vmul.f32 %v460_v42, %v230_v27 }
  0xba   : > { %v513_v37 = vmul.f32 %v439_v35, %v223_v34  ;;  %v633_v48 = vmul.f32 %v415_v40, %v231_v44  ;;  %v505_v56 = vmul.f32 %v415_v40, %v215_v50  ;;  %v641_v58 = vmul.f32 %v439_v35, %v239_v55  ;;  %v241_v35 = vld [vmem:[%s1894_s18 + $0xf8] sm:$0xff] }
  0xbb   : > { %v612_v26 = vsel %vm280_vm0, %v528_v23, 0.0  ;;  %v740_v32 = vsel %vm280_vm0, %v704_v29, 0.0  ;;  %v716_v49 = vsel %vm280_vm0, %v696_v46, 0.0  ;;  %v588_v51 = vsel %vm280_vm0, %v520_v47, 0.0  ;;  %v217_v23 = vld [vmem:[%s1894_s18 + $0x28] sm:$0xff] }
  0xbc   : > { %610 = vadd.xlane.f32.xlu1 %v609_v4  ;;  %v567_v41 = vsel %vm280_vm0, %v513_v37, 0.0  ;;  %v655_v52 = vsel %vm280_vm0, %v633_v48, 0.0  ;;  %v543_v59 = vsel %vm280_vm0, %v505_v56, 0.0  ;;  %v679_v1 = vsel %vm280_vm0, %v641_v58, 0.0 }
  0xbd   : > { %674 = vadd.xlane.f32.xlu2 %v673_v5  ;;  %538 = vadd.xlane.f32.xlu0 %v537_v6 }
  0xc0   : > { %v463_v61 = vpop.f32.mrf.mxu2  ;;  %v487_v0 = vpop.f32.mrf.mxu3 }
  0xc1   : > { %v418_v54 = vpop.f32.mrf.mxu0  ;;  %v442_v63 = vpop.f32.mrf.mxu1  ;;  %v521_v2 = vmul.f32 %v463_v61, %v231_v44  ;;  %v529_v4 = vmul.f32 %v487_v0, %v239_v55  ;;  %v705_v11 = vmul.f32 %v487_v0, %v223_v34  ;;  %v697_v12 = vmul.f32 %v463_v61, %v215_v50  ;;  %v233_v34 = vld [vmem:[%s1894_s18 + $0xb8] sm:$0xff] }
  0xc2   : > { %v506_v57 = vmul.f32 %v418_v54, %v216_v53  ;;  %v642_v3 = vmul.f32 %v442_v63, %v240_v62  ;;  %v634_v18 = vmul.f32 %v418_v54, %v232_v9  ;;  %v1983_v54 = vld [vmem:[%s1894_s18 + $0x70] sm:$0xff] }
  0xc3   : > { %v591_v5 = vsel %vm280_vm0, %v521_v2, 0.0  ;;  %v615_v6 = vsel %vm280_vm0, %v529_v4, 0.0  ;;  %v743_v14 = vsel %vm280_vm0, %v705_v11, 0.0  ;;  %v242_v4 = vld [vmem:[%s1894_s18 + $0x100] sm:$0xff] }
  0xc4   : > { %541 = vadd.xlane.f32.xlu1 %v540_v15  ;;  %v546_v60 = vsel %vm280_vm0, %v506_v57, 0.0  ;;  %v682_v7 = vsel %vm280_vm0, %v642_v3, 0.0  ;;  %v719_v15 = vsel %vm280_vm0, %v697_v12, 0.0  ;;  %v658_v22 = vsel %vm280_vm0, %v634_v18, 0.0 }
  0xc5   : > { %586 = vadd.xlane.f32.xlu2 %v585_v16  ;;  %562 = vadd.xlane.f32.xlu0 %v561_v17  ;;  %v224_v16 = vld [vmem:[%s1894_s18 + $0x60] sm:$0xff] }
  0xc6   : > { %v514_v19 = vmul.f32 %v442_v63, %v224_v16 }
  0xc8   : > { %v466_v8 = vpop.f32.mrf.mxu2  ;;  %v490_v21 = vpop.f32.mrf.mxu3 }
  0xc9   : > { %v522_v10 = vmul.f32 %v466_v8, %v232_v9  ;;  %v698_v17 = vmul.f32 %v466_v8, %v216_v53  ;;  %v421_v24 = vpop.f32.mrf.mxu0  ;;  %v706_v27 = vmul.f32 %v490_v21, %v224_v16 }
  0xca   : > { %v635_v38 = vmul.f32 %v421_v24, %v233_v34 }
  0xcb   : > { %v594_v13 = vsel %vm280_vm0, %v522_v10, 0.0  ;;  %v722_v20 = vsel %vm280_vm0, %v698_v17, 0.0  ;;  %v746_v30 = vsel %vm280_vm0, %v706_v27, 0.0 }
  0xcc   : > { %565 = vadd.xlane.f32.xlu1 %v564_v25  ;;  %v570_v25 = vsel %vm280_vm0, %v514_v19, 0.0 }
  0xcd   : > { %613 = vadd.xlane.f32.xlu2 %v612_v26  ;;  %650 = vadd.xlane.f32.xlu0 %v649_v28  ;;  %v530_v26 = vmul.f32 %v490_v21, %v240_v62  ;;  %v507_v28 = vmul.f32 %v421_v24, %v217_v23 }
  0xcf   : > { %v618_v29 = vsel %vm280_vm0, %v530_v26, 0.0  ;;  %v549_v31 = vsel %vm280_vm0, %v507_v28, 0.0  ;;  %v235_v28 = vld [vmem:[%s1894_s18 + $0xc8] sm:$0xff] }
  0xd1   : > { %v424_v53 = vpop.f32.mrf.mxu0 }
  0xd4   : > { %653 = vadd.xlane.f32.xlu1 %v652_v33  ;;  %v445_v33 = vpop.f32.mrf.mxu1 }
  0xd5   : > { %741 = vadd.xlane.f32.xlu2 %v740_v32  ;;  %714 = vadd.xlane.f32.xlu0 %v713_v36  ;;  %v225_v32 = vld [vmem:[%s1894_s18 + $0x68] sm:$0xff]  ;;  %v493_v36 = vpop.f32.mrf.mxu3  ;;  %v643_v46 = vmul.f32 %v445_v33, %v241_v35 }
  0xd6   : > { %v515_v37 = vmul.f32 %v445_v33, %v225_v32  ;;  %v531_v39 = vmul.f32 %v493_v36, %v241_v35  ;;  %v707_v44 = vmul.f32 %v493_v36, %v225_v32 }
  0xd8   : > { %v573_v40 = vsel %vm280_vm0, %v515_v37, 0.0  ;;  %v621_v42 = vsel %vm280_vm0, %v531_v39, 0.0  ;;  %v749_v50 = vsel %vm280_vm0, %v707_v44, 0.0 }
  0xdc   : > { %677 = vadd.xlane.f32.xlu1 %v676_v43  ;;  %v469_v43 = vpop.f32.mrf.mxu2  ;;  %v448_v55 = vpop.f32.mrf.mxu1 }
  0xdd   : > { %568 = vadd.xlane.f32.xlu2 %v567_v41  ;;  %738 = vadd.xlane.f32.xlu0 %v737_v45  ;;  %v661_v41 = vsel %vm280_vm0, %v635_v38, 0.0  ;;  %v523_v45 = vmul.f32 %v469_v43, %v233_v34  ;;  %v516_v57 = vmul.f32 %v448_v55, %v1983_v54  ;;  %v699_v58 = vmul.f32 %v469_v43, %v217_v23  ;;  %v427_v23 = vpop.f32.mrf.mxu0 }
  0xde   : > { %v644_v10 = vmul.f32 %v448_v55, %v242_v4 }
  0xdf   : > { %v576_v63 = vsel %vm280_vm0, %v516_v57, 0.0 }
  0xe0   : > { %v688_v21 = vsel %vm280_vm0, %v644_v10, 0.0 }
  0xe4   : > { %717 = vadd.xlane.f32.xlu1 %v716_v49  ;;  %v597_v49 = vsel %vm280_vm0, %v523_v45, 0.0 }
  0xe5   : > { %589 = vadd.xlane.f32.xlu0 %v588_v51  ;;  %656 = vadd.xlane.f32.xlu2 %v655_v52  ;;  %v685_v51 = vsel %vm280_vm0, %v643_v46, 0.0  ;;  %v1980_v52 = vld [vmem:[%s1894_s18 + $0x30] sm:$0xff] }
  0xe6   : > { %v508_v56 = vmul.f32 %v424_v53, %v1980_v52 }
  0xe8   : > { %v552_v0 = vsel %vm280_vm0, %v508_v56, 0.0 }
  0xec   : > { %544 = vadd.xlane.f32.xlu1 %v543_v59 }
  0xed   : > { %680 = vadd.xlane.f32.xlu0 %v679_v1  ;;  %547 = vadd.xlane.f32.xlu2 %v546_v60  ;;  %v1994_v1 = vpop.f32.mrf.mxu2 }
  0xf4   : > { %592 = vadd.xlane.f32.xlu1 %v591_v5  ;;  %v725_v5 = vsel %vm280_vm0, %v699_v58, 0.0 }
  0xf5   : > { %616 = vadd.xlane.f32.xlu0 %v615_v6  ;;  %683 = vadd.xlane.f32.xlu2 %v682_v7  ;;  %v234_v6 = vld [vmem:[%s1894_s18 + $0xc0] sm:$0xff] }
  0xf6   : > { %v524_v9 = vmul.f32 %v1994_v1, %v234_v6  ;;  %v636_v12 = vmul.f32 %v424_v53, %v234_v6 }
  0xf8   : > { %v600_v18 = vsel %vm280_vm0, %v524_v9, 0.0  ;;  %v664_v33 = vsel %vm280_vm0, %v636_v12, 0.0  ;;  %v2056_v12 = vstv %s2036_s24 }
  0xfc   : > { %744 = vadd.xlane.f32.xlu1 %v743_v14 }
  0xfd   : > { %720 = vadd.xlane.f32.xlu0 %v719_v15  ;;  %595 = vadd.xlane.f32.xlu2 %v594_v13 }
 0x104   : > { %659 = vadd.xlane.f32.xlu1 %v658_v22  ;;  %v219_v22 = vld [vmem:[%s1894_s18 + $0x38] sm:$0xff] }
 0x105   : > { %571 = vadd.xlane.f32.xlu0 %v570_v25  ;;  %723 = vadd.xlane.f32.xlu2 %v722_v20  ;;  %v509_v36 = vmul.f32 %v427_v23, %v219_v22 }
 0x10c   : > { %619 = vadd.xlane.f32.xlu1 %v618_v29  ;;  %v475_v29 = vpop.f32.mrf.mxu2 }
 0x10d   : > { %747 = vadd.xlane.f32.xlu0 %v746_v30  ;;  %550 = vadd.xlane.f32.xlu2 %v549_v31  ;;  %v2027_v30 = vpop.f32.mrf.mxu3  ;;  %v525_v39 = vmul.f32 %v475_v29, %v235_v28 }
 0x114   : > { %574 = vadd.xlane.f32.xlu1 %v573_v40  ;;  %v532_v40 = vmul.f32 %v2027_v30, %v242_v4  ;;  %v637_v4 = vmul.f32 %v427_v23, %v235_v28 }
 0x115   : > { %662 = vadd.xlane.f32.xlu0 %v661_v41  ;;  %622 = vadd.xlane.f32.xlu2 %v621_v42 }
 0x116   : > { %v624_v53 = vsel %vm280_vm0, %v532_v40, 0.0 }
 0x118   : > { %v1972_v47 = vpop.xlane.xlu2 %559  ;;  %v1974_v48 = vpop.xlane.xlu0 %535 }
 0x11c   : > { %686 = vadd.xlane.f32.xlu1 %v685_v51  ;;  %v603_v51 = vsel %vm280_vm0, %v525_v39, 0.0 }
 0x11d   : > { %598 = vadd.xlane.f32.xlu0 %v597_v49  ;;  %750 = vadd.xlane.f32.xlu2 %v749_v50  ;;  %v555_v50 = vsel %vm280_vm0, %v509_v36, 0.0 }
 0x11f   : > { %v1987_v59 = vpop.xlane.xlu1 %583 }
 0x120   : > { %v648_v60 = vpop.xlane.xlu2 %647  ;;  %v672_v61 = vpop.xlane.xlu0 %671 }
 0x121   : > { %v1990_v62 = vmax.f32 %v648_v60, %v1987_v59 }
 0x123   : > { %v806_v2 = vsub.f32 %v648_v60, %v1990_v62  ;;  %v934_v3 = vsub.f32 %v1987_v59, %v1990_v62 }
 0x124   : > { %726 = vadd.xlane.f32.xlu1 %v725_v5 }
 0x125   : > { %v854_v7 = vmul.f32 1.442695, %v806_v2  ;;  %v982_v8 = vmul.f32 1.442695, %v934_v3  ;;  %577 = vadd.xlane.f32.xlu2 %v576_v63  ;;  %553 = vadd.xlane.f32.xlu0 %v552_v0  ;;  %v701_v2 = vmul.f32 %v475_v29, %v219_v22  ;;  %v499_v22 = vpop.f32.mrf.mxu3 }
 0x127   : > { %1487 = vpow2.f32 %v854_v7  ;;  %v736_v11 = vpop.xlane.xlu1 %735 }
 0x128   : > { %1489 = vpow2.f32 %v982_v8  ;;  %v2004_v13 = vmax.f32 %v1972_v47, %v736_v11  ;;  %v712_v14 = vpop.xlane.xlu2 %711  ;;  %v2006_v15 = vpop.xlane.xlu0 %607  ;;  %v700_v8 = vmul.f32 %v1994_v1, %v1980_v52  ;;  %v667_v52 = vsel %vm280_vm0, %v637_v4, 0.0  ;;  %v227_v1 = vld [vmem:[%s1894_s18 + $0x78] sm:$0xff] }
 0x129   : > { %v2009_v16 = vmax.f32 %v1974_v48, %v712_v14  ;;  %v2012_v17 = vmax.f32 %v672_v61, %v2006_v15  ;;  %v709_v4 = vmul.f32 %v499_v22, %v227_v1 }
 0x12a   : > { %v798_v19 = vsub.f32 %v1972_v47, %v2004_v13  ;;  %v926_v20 = vsub.f32 %v736_v11, %v2004_v13 }
 0x12b   : > { %v790_v24 = vsub.f32 %v1974_v48, %v2009_v16  ;;  %v918_v25 = vsub.f32 %v712_v14, %v2009_v16  ;;  %v814_v26 = vsub.f32 %v672_v61, %v2012_v17  ;;  %v942_v27 = vsub.f32 %v2006_v15, %v2012_v17 }
 0x12c   : > { %v838_v31 = vmul.f32 1.442695, %v798_v19  ;;  %v966_v32 = vmul.f32 1.442695, %v926_v20  ;;  %601 = vadd.xlane.f32.xlu1 %v600_v18  ;;  %v731_v20 = vsel %vm280_vm0, %v701_v2, 0.0 }
 0x12d   : > { %v1488_v34 = vpop.eup %1487  ;;  %v822_v35 = vmul.f32 1.442695, %v790_v24  ;;  %665 = vadd.xlane.f32.xlu2 %v664_v33  ;;  %689 = vadd.xlane.f32.xlu0 %v688_v21  ;;  %v950_v38 = vmul.f32 1.442695, %v918_v25  ;;  %v870_v42 = vmul.f32 1.442695, %v814_v26  ;;  %v451_v24 = vpop.f32.mrf.mxu1 }
 0x12e   : > { %v1490_v37 = vpop.eup %1489  ;;  %1491 = vpow2.f32 %v838_v31  ;;  %v998_v44 = vmul.f32 1.442695, %v942_v27  ;;  %v243_v21 = vld [vmem:[%s1894_s18 + $0x108] sm:$0xff]  ;;  %v728_v26 = vsel %vm280_vm0, %v700_v8, 0.0  ;;  %v517_v31 = vmul.f32 %v451_v24, %v227_v1 }
 0x12f   : > { %v1030_v41 = vadd.f32 %v1490_v37, %v1488_v34  ;;  %1493 = vpow2.f32 %v966_v32  ;;  %v2031_v43 = vpop.xlane.xlu1 %610  ;;  %v645_v32 = vmul.f32 %v451_v24, %v243_v21 }
 0x130   : > { %1495 = vpow2.f32 %v822_v35  ;;  %v675_v45 = vpop.xlane.xlu2 %674  ;;  %v2033_v46 = vpop.xlane.xlu0 %538 }
 0x131   : > { %1497 = vlog2.f32 %v1030_v41  ;;  %v2039_v49 = vmax.f32 %v675_v45, %v2031_v43 }
 0x132   : > { %1499 = vpow2.f32 %v950_v38 }
 0x133   : > { %1501 = vpow2.f32 %v870_v42  ;;  %v815_v55 = vsub.f32 %v675_v45, %v2039_v49  ;;  %v943_v56 = vsub.f32 %v2031_v43, %v2039_v49  ;;  %v579_v45 = vsel %vm280_vm0, %v517_v31, 0.0 }
 0x134   : > { %v1492_v57 = vpop.eup %1491  ;;  %1503 = vpow2.f32 %v998_v44  ;;  %556 = vadd.xlane.f32.xlu1 %v555_v50  ;;  %v691_v44 = vsel %vm280_vm0, %v645_v32, 0.0 }
 0x135   : > { %v1494_v58 = vpop.eup %1493  ;;  %v872_v60 = vmul.f32 1.442695, %v815_v55  ;;  %v1000_v61 = vmul.f32 1.442695, %v943_v56  ;;  %604 = vadd.xlane.f32.xlu2 %v603_v51  ;;  %625 = vadd.xlane.f32.xlu0 %v624_v53 }
 0x136   : > { %v1496_v63 = vpop.eup %1495  ;;  %v1022_v0 = vadd.f32 %v1494_v58, %v1492_v57 }
 0x137   : > { %v1498_v3 = vpop.eup %1497  ;;  %1505 = vpow2.f32 %v872_v60  ;;  %v2047_v5 = vpop.xlane.xlu1 %541 }
 0x138   : > { %v1500_v6 = vpop.eup %1499  ;;  %v1079_v7 = vmul.f32 0.6931472, %v1498_v3  ;;  %1507 = vlog2.f32 %v1022_v0  ;;  %v2051_v9 = vpop.xlane.xlu2 %586  ;;  %v708_v0 = vmul.f32 %v2027_v30, %v1983_v54 }
 0x139   : > { %v2053_v10 = vpop.xlane.xlu0 %562  ;;  %v1502_v11 = vpop.eup %1501  ;;  %v1014_v14 = vadd.f32 %v1500_v6, %v1496_v63  ;;  %1509 = vpow2.f32 %v1000_v61 }
 0x13a   : > { %v1504_v18 = vpop.eup %1503  ;;  %v1126_v19 = vadd.f32 %v1079_v7, %v1990_v62  ;;  %v533_v62 = vmul.f32 %v499_v22, %v243_v21  ;;  %v752_v30 = vsel %vm280_vm0, %v708_v0, 0.0  ;;  %v755_v21 = vsel %vm280_vm0, %v709_v4, 0.0 }
 0x13b   : > { %1511 = vlog2.f32 %v1014_v14  ;;  %v1038_v23 = vadd.f32 %v1504_v18, %v1502_v11 }
 0x13c   : > { %v1160_v25 = vsub.f32 %v1126_v19, %v2056_v12  ;;  %668 = vadd.xlane.f32.xlu1 %v667_v52  ;;  %v627_v42 = vsel %vm280_vm0, %v533_v62, 0.0  ;;  %vm1336_vm0 = vcmask 1041409  }
 0x13d   : > { %v1506_v27 = vpop.eup %1505  ;;  %1513 = vlog2.f32 %v1038_v23  ;;  %732 = vadd.xlane.f32.xlu2 %v731_v20  ;;  %729 = vadd.xlane.f32.xlu0 %v728_v26 }
 0x13e   : > { %v1508_v28 = vpop.eup %1507  ;;  %v2066_v29 = vsub.f32 %v1160_v25, %v1987_v59 }
 0x13f   : > { %v1510_v33 = vpop.eup %1509  ;;  %v1063_v34 = vmul.f32 0.6931472, %v1508_v28  ;;  %v2068_v35 = vpop.xlane.xlu1 %565 }
 0x140   : > { %v1039_v36 = vadd.f32 %v1510_v33, %v1506_v27  ;;  %v2070_v37 = vpop.xlane.xlu2 %613 }
 0x141   : > { %v651_v38 = vpop.xlane.xlu0 %650  ;;  %v1512_v39 = vpop.eup %1511  ;;  %v1118_v40 = vadd.f32 %v1063_v34, %v2004_v13 }
 0x142   : > { %v2074_v41 = vmax.f32 %v651_v38, %v2051_v9  ;;  %v1047_v59 = vmul.f32 0.6931472, %v1512_v39  ;;  %1515 = vlog2.f32 %v1039_v36 }
 0x143   : > { %v1514_v50 = vpop.eup %1513  ;;  %v1152_v51 = vsub.f32 %v1118_v40, %v2056_v12 }
 0x144   : > { %v807_v53 = vsub.f32 %v651_v38, %v2074_v41  ;;  %v935_v55 = vsub.f32 %v2051_v9, %v2074_v41  ;;  %v1110_v13 = vadd.f32 %v1047_v59, %v2009_v16  ;;  %v1095_v56 = vmul.f32 0.6931472, %v1514_v50  ;;  %628 = vadd.xlane.f32.xlu1 %v627_v42 }
 0x145   : > { %v2085_v57 = vsub.f32 %v1152_v51, %v1972_v47  ;;  %692 = vadd.xlane.f32.xlu2 %v691_v44  ;;  %580 = vadd.xlane.f32.xlu0 %v579_v45  ;;  %v1208_v42 = vlaneseq }
 0x146   : > { %v856_v58 = vmul.f32 1.442695, %v807_v53  ;;  %v984_v60 = vmul.f32 1.442695, %v935_v55  ;;  %v1144_v61 = vsub.f32 %v1110_v13, %v2056_v12  ;;  %v1134_v63 = vadd.f32 %v1095_v56, %v2012_v17 }
 0x147   : > { %v2091_v2 = vpop.xlane.xlu1 %653 }
 0x148   : > { %1517 = vpow2.f32 %v856_v58  ;;  %v1516_v16 = vpop.eup %1515  ;;  %v2094_v3 = vsub.f32 %v1144_v61, %v1974_v48  ;;  %v1168_v47 = vsub.f32 %v1134_v63, %v2056_v12  ;;  %v742_v6 = vpop.xlane.xlu2 %741  ;;  %v2140_v63 = vand.u32 127, %v1208_v42 }
 0x149   : > { %1519 = vpow2.f32 %v984_v60  ;;  %v715_v7 = vpop.xlane.xlu0 %714  ;;  %v1097_v8 = vmul.f32 0.6931472, %v1516_v16  ;;  %v2098_v11 = vmax.f32 %v2068_v35, %v742_v6 }
 0x14a   : > { %v2101_v17 = vmax.f32 %v2033_v46, %v715_v7  ;;  %v2104_v54 = vsub.f32 %v1168_v47, %v2006_v15 }
 0x14b   : > { %v1135_v48 = vadd.f32 %v1097_v8, %v2039_v49  ;;  %v800_v14 = vsub.f32 %v2068_v35, %v2098_v11  ;;  %v928_v18 = vsub.f32 %v742_v6, %v2098_v11 }
 0x14c   : > { %v791_v19 = vsub.f32 %v2033_v46, %v2101_v17  ;;  %v919_v20 = vsub.f32 %v715_v7, %v2101_v17  ;;  %753 = vadd.xlane.f32.xlu1 %v752_v30 }
 0x14d   : > { %v1169_v15 = vsub.f32 %v1135_v48, %v2056_v12  ;;  %v842_v23 = vmul.f32 1.442695, %v800_v14  ;;  %v970_v52 = vmul.f32 1.442695, %v928_v18  ;;  %756 = vadd.xlane.f32.xlu0 %v755_v21  ;;  %v2155_v48 = vadd.s32 4294967288, %v2140_v63 }
 0x14e   : > { %v1518_v22 = vpop.eup %1517  ;;  %v824_v1 = vmul.f32 1.442695, %v791_v19  ;;  %v952_v26 = vmul.f32 1.442695, %v919_v20 }
 0x14f   : > { %v1520_v49 = vpop.eup %1519  ;;  %v2117_v24 = vsub.f32 %v1169_v15, %v2031_v43  ;;  %1521 = vpow2.f32 %v842_v23  ;;  %v678_v27 = vpop.xlane.xlu1 %677 }
 0x150   : > { %v1031_v25 = vadd.f32 %v1520_v49, %v1518_v22  ;;  %1523 = vpow2.f32 %v970_v52  ;;  %v2120_v62 = vmax.f32 %v678_v27, %v2070_v37  ;;  %v2122_v28 = vpop.xlane.xlu2 %568 }
 0x151   : > { %v739_v31 = vpop.xlane.xlu0 %738 }
 0x152   : > { %1525 = vlog2.f32 %v1031_v25  ;;  %v2125_v32 = vmax.f32 %v2053_v10, %v739_v31  ;;  %v816_v33 = vsub.f32 %v678_v27, %v2120_v62  ;;  %v944_v43 = vsub.f32 %v2070_v37, %v2120_v62 }
 0x153   : > { %1527 = vpow2.f32 %v824_v1  ;;  %v1305_v1 = vperm.slane %v2066_v29, %v2140_v63 }
 0x154   : > { %1529 = vpow2.f32 %v952_v26  ;;  %v799_v34 = vsub.f32 %v2053_v10, %v2125_v32  ;;  %v927_v36 = vsub.f32 %v739_v31, %v2125_v32  ;;  %v874_v38 = vmul.f32 1.442695, %v816_v33 }
 0x155   : > { %v1002_v39 = vmul.f32 1.442695, %v944_v43  ;;  %v1522_v40 = vpop.eup %1521 }
 0x156   : > { %v840_v59 = vmul.f32 1.442695, %v799_v34  ;;  %v1524_v44 = vpop.eup %1523  ;;  %1531 = vpow2.f32 %v874_v38  ;;  %v968_v45 = vmul.f32 1.442695, %v927_v36 }
 0x157   : > { %v1024_v51 = vadd.f32 %v1524_v44, %v1522_v40  ;;  %1533 = vpow2.f32 %v1002_v39  ;;  %v718_v53 = vpop.xlane.xlu1 %717 }
 0x158   : > { %v1526_v50 = vpop.eup %1525  ;;  %1535 = vpow2.f32 %v840_v59  ;;  %v2134_v56 = vmax.f32 %v2047_v5, %v718_v53  ;;  %v2138_v60 = vpop.xlane.xlu2 %656 }
 0x159   : > { %v1528_v55 = vpop.eup %1527  ;;  %v1081_v13 = vmul.f32 0.6931472, %v1526_v50  ;;  %v2136_v58 = vpop.xlane.xlu0 %589  ;;  %1537 = vlog2.f32 %v1024_v51 }
 0x15a   : > { %v1530_v61 = vpop.eup %1529  ;;  %v2144_v0 = vmax.f32 %v2091_v2, %v2136_v58  ;;  %1539 = vpow2.f32 %v968_v45  ;;  %v792_v4 = vsub.f32 %v2047_v5, %v2134_v56  ;;  %v920_v6 = vsub.f32 %v718_v53, %v2134_v56 }
 0x15b   : > { %v1127_v16 = vadd.f32 %v1081_v13, %v2074_v41  ;;  %v1015_v47 = vadd.f32 %v1530_v61, %v1528_v55 }
 0x15c   : > { %v808_v7 = vsub.f32 %v2091_v2, %v2144_v0  ;;  %v936_v8 = vsub.f32 %v2136_v58, %v2144_v0  ;;  %v1532_v30 = vpop.eup %1531  ;;  %v826_v41 = vmul.f32 1.442695, %v792_v4  ;;  %v954_v19 = vmul.f32 1.442695, %v920_v6 }
 0x15d   : > { %v1161_v14 = vsub.f32 %v1127_v16, %v2056_v12  ;;  %1541 = vlog2.f32 %v1015_v47  ;;  %v1534_v18 = vpop.eup %1533 }
 0x15e   : > { %v858_v20 = vmul.f32 1.442695, %v808_v7  ;;  %v1536_v21 = vpop.eup %1535  ;;  %v1040_v15 = vadd.f32 %v1534_v18, %v1532_v30  ;;  %1543 = vpow2.f32 %v826_v41  ;;  %v986_v2 = vmul.f32 1.442695, %v936_v8 }
 0x15f   : > { %v1193_v22 = vsub.f32 %v1161_v14, %v2051_v9  ;;  %v1538_v23 = vpop.eup %1537  ;;  %1545 = vpow2.f32 %v954_v19  ;;  %v2159_v52 = vpop.xlane.xlu1 %544  ;;  %v1244_v30 = vperm.slane %v2094_v3, %v2140_v63 }
 0x160   : > { %v1540_v49 = vpop.eup %1539  ;;  %v1067_v26 = vmul.f32 0.6931472, %v1538_v23  ;;  %1547 = vlog2.f32 %v1040_v15  ;;  %v2164_v31 = vpop.xlane.xlu2 %547 }
 0x161   : > { %v1306_v25 = vperm.slane %v1193_v22, %v2155_v48  ;;  %v681_v27 = vpop.xlane.xlu0 %680  ;;  %v1023_v9 = vadd.f32 %v1540_v49, %v1536_v21  ;;  %1549 = vpow2.f32 %v858_v20 }
 0x162   : > { %v1120_v43 = vadd.f32 %v1067_v26, %v2098_v11  ;;  %1551 = vpow2.f32 %v986_v2 }
 0x163   : > { %v1542_v33 = vpop.eup %1541  ;;  %v2168_v34 = vsel %vm1247_vm1, %v1306_v25, %v1305_v1  ;;  %1553 = vlog2.f32 %v1023_v9 }
 0x164   : > { %v1049_v36 = vmul.f32 0.6931472, %v1542_v33  ;;  %v1544_v38 = vpop.eup %1543  ;;  %v1154_v29 = vsub.f32 %v1120_v43, %v2056_v12 }
 0x165   : > { %v1546_v39 = vpop.eup %1545 }
 0x166   : > { %v1111_v40 = vadd.f32 %v1049_v36, %v2101_v17  ;;  %v1548_v42 = vpop.eup %1547  ;;  %v2173_v59 = vsub.f32 %v1154_v29, %v2068_v35  ;;  %v1016_v44 = vadd.f32 %v1546_v39, %v1544_v38  ;;  %v1249_v36 = vadd.s32 4294967280, %v2140_v63 }
 0x167   : > { %v1550_v45 = vpop.eup %1549  ;;  %v1099_v50 = vmul.f32 0.6931472, %v1548_v42  ;;  %v2176_v51 = vpop.xlane.xlu1 %592 }
 0x168   : > { %v1145_v11 = vsub.f32 %v1111_v40, %v2056_v12  ;;  %v1552_v53 = vpop.eup %1551  ;;  %1555 = vlog2.f32 %v1016_v44  ;;  %v2180_v55 = vmax.f32 %v2138_v60, %v2176_v51  ;;  %v2184_v17 = vpop.xlane.xlu2 %683 }
 0x169   : > { %v2182_v13 = vpop.xlane.xlu0 %616  ;;  %v1554_v61 = vpop.eup %1553  ;;  %v1136_v16 = vadd.f32 %v1099_v50, %v2120_v62  ;;  %v1032_v47 = vadd.f32 %v1552_v53, %v1550_v45 }
 0x16a   : > { %v1177_v35 = vsub.f32 %v1145_v11, %v2033_v46  ;;  %v1065_v4 = vmul.f32 0.6931472, %v1554_v61  ;;  %v809_v6 = vsub.f32 %v2138_v60, %v2180_v55  ;;  %v937_v7 = vsub.f32 %v2176_v51, %v2180_v55 }
 0x16b   : > { %v2193_v8 = vmax.f32 %v681_v27, %v2182_v13  ;;  %v1170_v46 = vsub.f32 %v1136_v16, %v2056_v12  ;;  %1557 = vlog2.f32 %v1032_v47 }
 0x16c   : > { %v1246_v14 = vperm.slane %v1177_v35, %v2155_v48  ;;  %v1119_v62 = vadd.f32 %v1065_v4, %v2125_v32  ;;  %v860_v41 = vmul.f32 1.442695, %v809_v6  ;;  %v988_v18 = vmul.f32 1.442695, %v937_v7 }
 0x16d   : > { %v817_v60 = vsub.f32 %v681_v27, %v2193_v8  ;;  %v2202_v19 = vsub.f32 %v1170_v46, %v2070_v37  ;;  %v945_v21 = vsub.f32 %v2182_v13, %v2193_v8 }
 0x16e   : > { %v1248_v20 = vsel %vm1247_vm1, %v1246_v14, %v1244_v30  ;;  %v1556_v3 = vpop.eup %1555  ;;  %v1153_v48 = vsub.f32 %v1119_v62, %v2056_v12  ;;  %1559 = vpow2.f32 %v860_v41 }
 0x16f   : > { %v876_v22 = vmul.f32 1.442695, %v817_v60  ;;  %v1051_v15 = vmul.f32 0.6931472, %v1556_v3  ;;  %1561 = vpow2.f32 %v988_v18  ;;  %v1004_v32 = vmul.f32 1.442695, %v945_v21  ;;  %v745_v2 = vpop.xlane.xlu1 %744 }
 0x170   : > { %v2209_v23 = vsub.f32 %v1153_v48, %v2053_v10  ;;  %v2212_v37 = vmax.f32 %v2122_v28, %v745_v2  ;;  %v2214_v1 = vpop.xlane.xlu2 %595 }
 0x171   : > { %1563 = vpow2.f32 %v876_v22  ;;  %v721_v49 = vpop.xlane.xlu0 %720  ;;  %v1558_v25 = vpop.eup %1557  ;;  %v1112_v26 = vadd.f32 %v1051_v15, %v2134_v56 }
 0x172   : > { %1565 = vpow2.f32 %v1004_v32  ;;  %v2218_v27 = vmax.f32 %v2159_v52, %v721_v49  ;;  %v1083_v9 = vmul.f32 0.6931472, %v1558_v25  ;;  %v801_v33 = vsub.f32 %v2122_v28, %v2212_v37 }
 0x173   : > { %v929_v10 = vsub.f32 %v745_v2, %v2212_v37  ;;  %v1146_v43 = vsub.f32 %v1112_v26, %v2056_v12 }
 0x174   : > { %v793_v38 = vsub.f32 %v2159_v52, %v2218_v27  ;;  %v921_v29 = vsub.f32 %v721_v49, %v2218_v27  ;;  %v1560_v56 = vpop.eup %1559  ;;  %v1128_v39 = vadd.f32 %v1083_v9, %v2144_v0  ;;  %v844_v40 = vmul.f32 1.442695, %v801_v33 }
 0x175   : > { %v972_v42 = vmul.f32 1.442695, %v929_v10  ;;  %v1562_v44 = vpop.eup %1561  ;;  %v1178_v45 = vsub.f32 %v1146_v43, %v2047_v5 }
 0x176   : > { %v828_v11 = vmul.f32 1.442695, %v793_v38  ;;  %v1162_v53 = vsub.f32 %v1128_v39, %v2056_v12  ;;  %v1033_v61 = vadd.f32 %v1562_v44, %v1560_v56  ;;  %1567 = vpow2.f32 %v844_v40 }
 0x177   : > { %v1564_v50 = vpop.eup %1563  ;;  %v1250_v16 = vperm.slane %v1178_v45, %v1249_v36  ;;  %1569 = vpow2.f32 %v972_v42  ;;  %v956_v47 = vmul.f32 1.442695, %v921_v29  ;;  %v660_v4 = vpop.xlane.xlu1 %659  ;;  %v1253_v42 = vadd.s32 4294967272, %v2140_v63 }
 0x178   : > { %v1566_v35 = vpop.eup %1565  ;;  %v1194_v6 = vsub.f32 %v1162_v53, %v2136_v58  ;;  %1571 = vlog2.f32 %v1033_v61  ;;  %v2233_v7 = vmax.f32 %v660_v4, %v2214_v1  ;;  %v724_v30 = vpop.xlane.xlu2 %723 }
 0x179   : > { %v1041_v0 = vadd.f32 %v1566_v35, %v1564_v50  ;;  %v2235_v5 = vpop.xlane.xlu0 %571  ;;  %v2238_v14 = vsel %vm1251_vm2, %v1250_v16, %v1248_v20  ;;  %1573 = vpow2.f32 %v828_v11  ;;  %v2241_v46 = vmax.f32 %v2164_v31, %v724_v30 }
 0x17a   : > { %v1308_v62 = vperm.slane %v1194_v6, %v1249_v36  ;;  %v810_v41 = vsub.f32 %v660_v4, %v2233_v7  ;;  %v938_v58 = vsub.f32 %v2214_v1, %v2233_v7 }
 0x17b   : > { %1575 = vlog2.f32 %v1041_v0  ;;  %v794_v18 = vsub.f32 %v2164_v31, %v2241_v46  ;;  %v922_v60 = vsub.f32 %v724_v30, %v2241_v46 }
 0x17c   : > { %1577 = vpow2.f32 %v956_v47  ;;  %v1568_v21 = vpop.eup %1567  ;;  %v1309_v20 = vsel %vm1251_vm2, %v1308_v62, %v2168_v34  ;;  %v862_v3 = vmul.f32 1.442695, %v810_v41  ;;  %v990_v48 = vmul.f32 1.442695, %v938_v58 }
 0x17d   : > { %v1570_v22 = vpop.eup %1569  ;;  %v830_v15 = vmul.f32 1.442695, %v794_v18  ;;  %v958_v49 = vmul.f32 1.442695, %v922_v60 }
 0x17e   : > { %v1572_v32 = vpop.eup %1571  ;;  %v1025_v2 = vadd.f32 %v1570_v22, %v1568_v21  ;;  %1579 = vpow2.f32 %v862_v3 }
 0x17f   : > { %v1574_v25 = vpop.eup %1573  ;;  %v1085_v26 = vmul.f32 0.6931472, %v1572_v32  ;;  %1581 = vpow2.f32 %v990_v48  ;;  %v2251_v9 = vpop.xlane.xlu1 %619 }
 0x180   : > { %1583 = vlog2.f32 %v1025_v2  ;;  %v2255_v10 = vmax.f32 %v2184_v17, %v2251_v9  ;;  %v2259_v43 = vpop.xlane.xlu2 %550 }
 0x181   : > { %v1576_v33 = vpop.eup %1575  ;;  %v2257_v34 = vpop.xlane.xlu0 %747  ;;  %v1129_v38 = vadd.f32 %v1085_v26, %v2180_v55  ;;  %1585 = vpow2.f32 %v830_v15 }
 0x182   : > { %v1578_v36 = vpop.eup %1577  ;;  %v1101_v29 = vmul.f32 0.6931472, %v1576_v33  ;;  %1587 = vpow2.f32 %v958_v49  ;;  %v818_v39 = vsub.f32 %v2184_v17, %v2255_v10  ;;  %v946_v40 = vsub.f32 %v2251_v9, %v2255_v10 }
 0x183   : > { %v1017_v56 = vadd.f32 %v1578_v36, %v1574_v25  ;;  %v1163_v44 = vsub.f32 %v1129_v38, %v2056_v12 }
 0x184   : > { %v1137_v45 = vadd.f32 %v1101_v29, %v2193_v8  ;;  %v1580_v11 = vpop.eup %1579  ;;  %v878_v50 = vmul.f32 1.442695, %v818_v39  ;;  %v1006_v55 = vmul.f32 1.442695, %v946_v40 }
 0x185   : > { %1589 = vlog2.f32 %v1017_v56  ;;  %v1582_v53 = vpop.eup %1581  ;;  %v1195_v61 = vsub.f32 %v1163_v44, %v2176_v51  ;;  %v1257_v56 = vadd.s32 4294967264, %v2140_v63 }
 0x186   : > { %v1171_v35 = vsub.f32 %v1137_v45, %v2056_v12  ;;  %v1584_v16 = vpop.eup %1583  ;;  %v1034_v17 = vadd.f32 %v1582_v53, %v1580_v11  ;;  %1591 = vpow2.f32 %v878_v50 }
 0x187   : > { %v1586_v47 = vpop.eup %1585  ;;  %v1310_v4 = vperm.slane %v1195_v61, %v1253_v42  ;;  %v1069_v0 = vmul.f32 0.6931472, %v1584_v16  ;;  %1593 = vpow2.f32 %v1006_v55  ;;  %v2274_v8 = vpop.xlane.xlu1 %574 }
 0x188   : > { %v2272_v6 = vsub.f32 %v1171_v35, %v2182_v13  ;;  %v1588_v30 = vpop.eup %1587  ;;  %1595 = vlog2.f32 %v1034_v17  ;;  %v2276_v41 = vpop.xlane.xlu2 %622 }
 0x189   : > { %v663_v62 = vpop.xlane.xlu0 %662  ;;  %v1311_v51 = vsel %vm1255_vm3, %v1310_v4, %v1309_v20  ;;  %v1121_v58 = vadd.f32 %v1069_v0, %v2212_v37  ;;  %v1018_v18 = vadd.f32 %v1588_v30, %v1586_v47 }
 0x18b   : > { %v1590_v60 = vpop.eup %1589  ;;  %v1155_v21 = vsub.f32 %v1121_v58, %v2056_v12  ;;  %1597 = vlog2.f32 %v1018_v18 }
 0x18c   : > { %v1053_v3 = vmul.f32 0.6931472, %v1590_v60  ;;  %v1592_v13 = vpop.eup %1591 }
 0x18d   : > { %v1594_v48 = vpop.eup %1593  ;;  %v2282_v22 = vsub.f32 %v1155_v21, %v2122_v28 }
 0x18e   : > { %v1113_v15 = vadd.f32 %v1053_v3, %v2218_v27  ;;  %v1596_v32 = vpop.eup %1595  ;;  %v1042_v2 = vadd.f32 %v1594_v48, %v1592_v13 }
 0x18f   : > { %v1087_v20 = vmul.f32 0.6931472, %v1596_v32  ;;  %v687_v25 = vpop.xlane.xlu1 %686  ;;  %v2337_v32 = vmax.f32 %v2235_v5, %v2257_v34 }
 0x190   : > { %v1147_v49 = vsub.f32 %v1113_v15, %v2056_v12  ;;  %1599 = vlog2.f32 %v1042_v2  ;;  %v2288_v26 = vpop.xlane.xlu2 %750  ;;  %v2306_v35 = vmax.f32 %v687_v25, %v2276_v41 }
 0x191   : > { %v2286_v37 = vpop.xlane.xlu0 %598  ;;  %v1598_v33 = vpop.eup %1597  ;;  %v1130_v38 = vadd.f32 %v1087_v20, %v2233_v7 }
 0x192   : > { %v1179_v36 = vsub.f32 %v1147_v49, %v2159_v52  ;;  %v2293_v28 = vmax.f32 %v663_v62, %v2286_v37  ;;  %v1055_v27 = vmul.f32 0.6931472, %v1598_v33  ;;  %v819_v58 = vsub.f32 %v687_v25, %v2306_v35 }
 0x193   : > { %v1164_v39 = vsub.f32 %v1130_v38, %v2056_v12  ;;  %v947_v18 = vsub.f32 %v2276_v41, %v2306_v35 }
 0x194   : > { %v1254_v29 = vperm.slane %v1179_v36, %v1253_v42  ;;  %v811_v40 = vsub.f32 %v663_v62, %v2293_v28  ;;  %v1114_v44 = vadd.f32 %v1055_v27, %v2241_v46  ;;  %v939_v45 = vsub.f32 %v2286_v37, %v2293_v28 }
 0x195   : > { %v1196_v7 = vsub.f32 %v1164_v39, %v2214_v1  ;;  %v880_v48 = vmul.f32 1.442695, %v819_v58  ;;  %v1008_v2 = vmul.f32 1.442695, %v947_v18  ;;  %v1261_v58 = vadd.s32 4294967256, %v2140_v63 }
 0x196   : > { %v1256_v52 = vsel %vm1255_vm3, %v1254_v29, %v2238_v14  ;;  %v864_v11 = vmul.f32 1.442695, %v811_v40  ;;  %v1600_v50 = vpop.eup %1599  ;;  %v1148_v42 = vsub.f32 %v1114_v44, %v2056_v12  ;;  %v992_v55 = vmul.f32 1.442695, %v939_v45 }
 0x197   : > { %v1312_v53 = vperm.slane %v1196_v7, %v1257_v56  ;;  %v1103_v61 = vmul.f32 0.6931472, %v1600_v50  ;;  %v727_v46 = vpop.xlane.xlu1 %726  ;;  %v802_v29 = vsub.f32 %v2235_v5, %v2337_v32  ;;  %v930_v44 = vsub.f32 %v2257_v34, %v2337_v32 }
 0x198   : > { %v1180_v16 = vsub.f32 %v1148_v42, %v2164_v31  ;;  %1601 = vpow2.f32 %v864_v11  ;;  %v2310_v17 = vmax.f32 %v2259_v43, %v727_v46  ;;  %v2312_v14 = vpop.xlane.xlu2 %577 }
 0x199   : > { %v2314_v1 = vpop.xlane.xlu0 %553  ;;  %v1138_v47 = vadd.f32 %v1103_v61, %v2255_v10  ;;  %v2318_v4 = vsel %vm1259_vm4, %v1312_v53, %v1311_v51  ;;  %1603 = vpow2.f32 %v992_v55  ;;  %v846_v50 = vmul.f32 1.442695, %v802_v29 }
 0x19a   : > { %v1258_v0 = vperm.slane %v1180_v16, %v1257_v56  ;;  %v795_v30 = vsub.f32 %v2259_v43, %v2310_v17  ;;  %v923_v31 = vsub.f32 %v727_v46, %v2310_v17 }
 0x19b   : > { %v1172_v62 = vsub.f32 %v1138_v47, %v2056_v12  ;;  %v974_v47 = vmul.f32 1.442695, %v930_v44 }
 0x19c   : > { %v2328_v60 = vsel %vm1259_vm4, %v1258_v0, %v1256_v52  ;;  %v832_v10 = vmul.f32 1.442695, %v795_v30  ;;  %v960_v51 = vmul.f32 1.442695, %v923_v31 }
 0x19d   : > { %v2331_v21 = vsub.f32 %v1172_v62, %v2251_v9  ;;  %v2344_v9 = vmax.f32 %v2274_v8, %v2288_v26 }
 0x19e   : > { %v1602_v3 = vpop.eup %1601  ;;  %1605 = vpow2.f32 %v832_v10 }
 0x19f   : > { %v1604_v13 = vpop.eup %1603  ;;  %1607 = vpow2.f32 %v960_v51  ;;  %v2333_v15 = vpop.xlane.xlu1 %601  ;;  %v803_v52 = vsub.f32 %v2274_v8, %v2344_v9  ;;  %v931_v42 = vsub.f32 %v2288_v26, %v2344_v9 }
 0x1a0   : > { %v1035_v49 = vadd.f32 %v1604_v13, %v1602_v3  ;;  %v666_v20 = vpop.xlane.xlu2 %665 }
 0x1a1   : > { %v690_v25 = vpop.xlane.xlu0 %689  ;;  %v2340_v33 = vmax.f32 %v666_v20, %v2333_v15  ;;  %v848_v30 = vmul.f32 1.442695, %v803_v52  ;;  %v976_v31 = vmul.f32 1.442695, %v931_v42 }
 0x1a2   : > { %1609 = vlog2.f32 %v1035_v49 }
 0x1a3   : > { %1611 = vpow2.f32 %v880_v48  ;;  %v812_v36 = vsub.f32 %v666_v20, %v2340_v33  ;;  %v940_v38 = vsub.f32 %v2333_v15, %v2340_v33 }
 0x1a4   : > { %v1606_v27 = vpop.eup %1605  ;;  %1613 = vpow2.f32 %v1008_v2 }
 0x1a5   : > { %v1608_v56 = vpop.eup %1607  ;;  %v866_v39 = vmul.f32 1.442695, %v812_v36  ;;  %v994_v40 = vmul.f32 1.442695, %v940_v38 }
 0x1a6   : > { %v1019_v45 = vadd.f32 %v1608_v56, %v1606_v27 }
 0x1a7   : > { %1615 = vpow2.f32 %v866_v39  ;;  %v2355_v7 = vpop.xlane.xlu1 %556 }
 0x1a8   : > { %v1610_v11 = vpop.eup %1609  ;;  %1617 = vlog2.f32 %v1019_v45  ;;  %v2359_v55 = vpop.xlane.xlu2 %604 }
 0x1a9   : > { %v2361_v53 = vpop.xlane.xlu0 %625  ;;  %v1612_v61 = vpop.eup %1611  ;;  %v1089_v46 = vmul.f32 0.6931472, %v1610_v11  ;;  %1619 = vpow2.f32 %v994_v40 }
 0x1aa   : > { %v2364_v34 = vmax.f32 %v690_v25, %v2361_v53  ;;  %v1614_v16 = vpop.eup %1613  ;;  %1621 = vpow2.f32 %v846_v50 }
 0x1ab   : > { %v1131_v0 = vadd.f32 %v1089_v46, %v2293_v28  ;;  %v1043_v26 = vadd.f32 %v1614_v16, %v1612_v61  ;;  %1623 = vpow2.f32 %v974_v47 }
 0x1ac   : > { %v820_v10 = vsub.f32 %v690_v25, %v2364_v34  ;;  %1625 = vpow2.f32 %v848_v30 }
 0x1ad   : > { %v1616_v62 = vpop.eup %1615  ;;  %v1165_v18 = vsub.f32 %v1131_v0, %v2056_v12  ;;  %1627 = vpow2.f32 %v976_v31 }
 0x1ae   : > { %v1618_v51 = vpop.eup %1617  ;;  %1629 = vlog2.f32 %v1043_v26  ;;  %v882_v27 = vmul.f32 1.442695, %v820_v10 }
 0x1af   : > { %v1620_v3 = vpop.eup %1619  ;;  %v1197_v13 = vsub.f32 %v1165_v18, %v2286_v37  ;;  %v1057_v48 = vmul.f32 0.6931472, %v1618_v51  ;;  %v669_v2 = vpop.xlane.xlu1 %668  ;;  %v948_v37 = vsub.f32 %v2361_v53, %v2364_v34 }
 0x1b0   : > { %v1036_v28 = vadd.f32 %v1620_v3, %v1616_v62  ;;  %v2372_v49 = vmax.f32 %v669_v2, %v2359_v55  ;;  %v733_v20 = vpop.xlane.xlu2 %732  ;;  %v1622_v29 = vpop.eup %1621 }
 0x1b1   : > { %v730_v36 = vpop.xlane.xlu0 %729  ;;  %v1314_v38 = vperm.slane %v1197_v13, %v1261_v58  ;;  %v1115_v25 = vadd.f32 %v1057_v48, %v2310_v17  ;;  %v2381_v40 = vmax.f32 %v2355_v7, %v733_v20  ;;  %v1624_v52 = vpop.eup %1623  ;;  %v1010_v30 = vmul.f32 1.442695, %v948_v37 }
 0x1b2   : > { %v813_v56 = vsub.f32 %v669_v2, %v2372_v49  ;;  %v941_v39 = vsub.f32 %v2359_v55, %v2372_v49  ;;  %1631 = vlog2.f32 %v1036_v28  ;;  %v2389_v17 = vmax.f32 %v2314_v1, %v730_v36  ;;  %v1626_v46 = vpop.eup %1625 }
 0x1b3   : > { %v2385_v44 = vsel %vm1263_vm5, %v1314_v38, %v2318_v4  ;;  %v1149_v45 = vsub.f32 %v1115_v25, %v2056_v12  ;;  %v797_v42 = vsub.f32 %v2355_v7, %v2381_v40  ;;  %v925_v61 = vsub.f32 %v733_v20, %v2381_v40  ;;  %v1628_v0 = vpop.eup %1627 }
 0x1b4   : > { %v868_v11 = vmul.f32 1.442695, %v813_v56  ;;  %v996_v50 = vmul.f32 1.442695, %v941_v39  ;;  %1633 = vpow2.f32 %v882_v27  ;;  %v796_v4 = vsub.f32 %v2314_v1, %v2389_v17  ;;  %v1630_v26 = vpop.eup %1629 }
 0x1b5   : > { %v1181_v16 = vsub.f32 %v1149_v45, %v2259_v43  ;;  %v924_v47 = vsub.f32 %v730_v36, %v2389_v17  ;;  %v836_v31 = vmul.f32 1.442695, %v797_v42  ;;  %v964_v62 = vmul.f32 1.442695, %v925_v61 }
 0x1b6   : > { %1635 = vpow2.f32 %v868_v11  ;;  %v834_v10 = vmul.f32 1.442695, %v796_v4  ;;  %v1026_v2 = vadd.f32 %v1624_v52, %v1622_v29  ;;  %v1027_v36 = vadd.f32 %v1628_v0, %v1626_v46 }
 0x1b7   : > { %v1262_v18 = vperm.slane %v1181_v16, %v1261_v58  ;;  %1637 = vpow2.f32 %v996_v50  ;;  %v2398_v51 = vpop.xlane.xlu1 %628  ;;  %v962_v3 = vmul.f32 1.442695, %v924_v47  ;;  %v2410_v25 = vadd.s32 4294967232, %v2140_v63 }
 0x1b8   : > { %1639 = vpow2.f32 %v836_v31  ;;  %v693_v43 = vpop.xlane.xlu2 %692  ;;  %v1632_v48 = vpop.eup %1631  ;;  %v2413_v29 = vadd.s32 4294967224, %v2140_v63  ;;  %v2419_v11 = vadd.s32 4294967216, %v2140_v63 }
 0x1b9   : > { %v2400_v13 = vpop.xlane.xlu0 %580  ;;  %v2404_v28 = vsel %vm1263_vm5, %v1262_v18, %v2328_v60  ;;  %1641 = vpow2.f32 %v964_v62  ;;  %v2407_v58 = vmax.f32 %v693_v43, %v2398_v51  ;;  %v1091_v27 = vmul.f32 0.6931472, %v1632_v48 }
 0x1ba   : > { %1643 = vpow2.f32 %v1010_v30  ;;  %v1634_v20 = vpop.eup %1633  ;;  %v1320_v31 = vperm.slane %v2104_v54, %v2410_v25 }
 0x1bb   : > { %1645 = vpow2.f32 %v834_v10  ;;  %v821_v60 = vsub.f32 %v693_v43, %v2407_v58  ;;  %v949_v56 = vsub.f32 %v2398_v51, %v2407_v58  ;;  %v1132_v16 = vadd.f32 %v1091_v27, %v2340_v33 }
 0x1bc   : > { %v1636_v38 = vpop.eup %1635  ;;  %1647 = vpow2.f32 %v962_v3  ;;  %v2432_v33 = vadd.s32 4294967208, %v2140_v63 }
 0x1bd   : > { %v1638_v37 = vpop.eup %1637  ;;  %1649 = vlog2.f32 %v1026_v2  ;;  %v884_v50 = vmul.f32 1.442695, %v821_v60  ;;  %v1012_v42 = vmul.f32 1.442695, %v949_v56  ;;  %v1166_v27 = vsub.f32 %v1132_v16, %v2056_v12 }
 0x1be   : > { %v1640_v39 = vpop.eup %1639  ;;  %v1037_v45 = vadd.f32 %v1638_v37, %v1636_v38  ;;  %1651 = vlog2.f32 %v1027_v36  ;;  %v1105_v36 = vmul.f32 0.6931472, %v1630_v26 }
 0x1bf   : > { %v1642_v52 = vpop.eup %1641  ;;  %v754_v61 = vpop.xlane.xlu1 %753 }
 0x1c0   : > { %v1644_v46 = vpop.eup %1643  ;;  %1653 = vlog2.f32 %v1037_v45  ;;  %v1021_v4 = vadd.f32 %v1642_v52, %v1640_v39  ;;  %v2423_v47 = vmax.f32 %v2312_v14, %v754_v61  ;;  %v2444_v45 = vadd.s32 4294967200, %v2140_v63 }
 0x1c1   : > { %v1646_v0 = vpop.eup %1645  ;;  %1655 = vpow2.f32 %v884_v50  ;;  %v757_v18 = vpop.xlane.xlu0 %756  ;;  %v2447_v52 = vadd.s32 4294967192, %v2140_v63  ;;  %v1044_v50 = vadd.f32 %v1644_v46, %v1634_v20  ;;  %v1139_v20 = vadd.f32 %v1105_v36, %v2306_v35 }
 0x1c2   : > { %v1648_v10 = vpop.eup %1647  ;;  %1657 = vlog2.f32 %v1021_v4  ;;  %v804_v3 = vsub.f32 %v2312_v14, %v2423_v47  ;;  %v932_v43 = vsub.f32 %v754_v61, %v2423_v47  ;;  %v2441_v56 = vmax.f32 %v2400_v13, %v757_v18 }
 0x1c3   : > { %v1650_v48 = vpop.eup %1649  ;;  %v1020_v38 = vadd.f32 %v1648_v10, %v1646_v0  ;;  %1659 = vpow2.f32 %v1012_v42  ;;  %v2455_v10 = vadd.s32 4294967248, %v2140_v63  ;;  %v1198_v46 = vsub.f32 %v1166_v27, %v2333_v15 }
 0x1c4   : > { %v850_v37 = vmul.f32 1.442695, %v804_v3  ;;  %v978_v60 = vmul.f32 1.442695, %v932_v43  ;;  %v1652_v39 = vpop.eup %1651  ;;  %v1071_v26 = vmul.f32 0.6931472, %v1650_v48  ;;  %v805_v42 = vsub.f32 %v2400_v13, %v2441_v56 }
 0x1c5   : > { %1661 = vlog2.f32 %v1020_v38  ;;  %v933_v16 = vsub.f32 %v757_v18, %v2441_v56  ;;  %v1073_v30 = vmul.f32 0.6931472, %v1652_v39  ;;  %v1328_v27 = vperm.slane %v2331_v21, %v2444_v45 }
 0x1c6   : > { %v1654_v61 = vpop.eup %1653  ;;  %1663 = vpow2.f32 %v850_v37  ;;  %v852_v48 = vmul.f32 1.442695, %v805_v42  ;;  %v1122_v0 = vadd.f32 %v1071_v26, %v2337_v32 }
 0x1c7   : > { %v1656_v4 = vpop.eup %1655  ;;  %v1093_v3 = vmul.f32 0.6931472, %v1654_v61  ;;  %1665 = vpow2.f32 %v978_v60  ;;  %v980_v38 = vmul.f32 1.442695, %v933_v16  ;;  %v1269_v60 = vadd.s32 4294967240, %v2140_v63 }
 0x1c8   : > { %v1658_v43 = vpop.eup %1657  ;;  %1667 = vlog2.f32 %v1044_v50  ;;  %v1173_v50 = vsub.f32 %v1139_v20, %v2056_v12  ;;  %v1123_v26 = vadd.f32 %v1073_v30, %v2344_v9 }
 0x1c9   : > { %v1660_v37 = vpop.eup %1659  ;;  %v1133_v18 = vadd.f32 %v1093_v3, %v2372_v49  ;;  %v1061_v2 = vmul.f32 0.6931472, %v1658_v43  ;;  %1669 = vpow2.f32 %v852_v48  ;;  %v1316_v49 = vperm.slane %v1198_v46, %v2455_v10 }
 0x1ca   : > { %v1045_v62 = vadd.f32 %v1660_v37, %v1656_v4  ;;  %1671 = vpow2.f32 %v980_v38  ;;  %v2551_v37 = vperm.slane %v2117_v24, %v2413_v29 }
 0x1cb   : > { %v1662_v61 = vpop.eup %1661  ;;  %v1167_v35 = vsub.f32 %v1133_v18, %v2056_v12  ;;  %v1117_v15 = vadd.f32 %v1061_v2, %v2381_v40  ;;  %v1156_v40 = vsub.f32 %v1122_v0, %v2056_v12  ;;  %v1317_v9 = vsel %vm1267_vm6, %v1316_v49, %v2385_v44 }
 0x1cc   : > { %v1664_v36 = vpop.eup %1663  ;;  %v1059_v39 = vmul.f32 0.6931472, %v1662_v61  ;;  %1673 = vlog2.f32 %v1045_v62  ;;  %v1205_v0 = vsub.f32 %v1173_v50, %v2276_v41 }
 0x1cd   : > { %v1666_v32 = vpop.eup %1665  ;;  %v1199_v42 = vsub.f32 %v1167_v35, %v2359_v55  ;;  %v1151_v16 = vsub.f32 %v1117_v15, %v2056_v12  ;;  %v2552_v35 = vperm.slane %v2202_v19, %v2419_v11  ;;  %v1188_v19 = vsub.f32 %v1156_v40, %v2235_v5 }
 0x1ce   : > { %v1116_v2 = vadd.f32 %v1059_v39, %v2389_v17  ;;  %v1028_v4 = vadd.f32 %v1666_v32, %v1664_v36  ;;  %v1668_v21 = vpop.eup %1667  ;;  %v1157_v17 = vsub.f32 %v1123_v26, %v2056_v12  ;;  %v2554_v5 = vperm.slane %v2085_v57, %v2410_v25 }
 0x1cf   : > { %v1318_v3 = vperm.slane %v1199_v42, %v1269_v60  ;;  %v1183_v62 = vsub.f32 %v1151_v16, %v2355_v7  ;;  %v1670_v43 = vpop.eup %1669  ;;  %v1107_v48 = vmul.f32 0.6931472, %v1668_v21  ;;  %v1290_v16 = vperm.slane %v1188_v19, %v2444_v45 }
 0x1d0   : > { %v1150_v55 = vsub.f32 %v1116_v2, %v2056_v12  ;;  %1675 = vlog2.f32 %v1028_v4  ;;  %v1672_v30 = vpop.eup %1671  ;;  %v1297_v40 = vadd.s32 4294967184, %v2140_v63 }
 0x1d1   : > { %v1319_v20 = vsel %vm1271_vm7, %v1318_v3, %v1317_v9  ;;  %v1029_v38 = vadd.f32 %v1672_v30, %v1670_v43  ;;  %v1270_v18 = vperm.slane %v1183_v62, %v1269_v60  ;;  %v2553_v60 = vperm.slane %v2272_v6, %v2432_v33 }
 0x1d2   : > { %v1674_v46 = vpop.eup %1673  ;;  %v1321_v7 = vsel %vm1275_vm8, %v1320_v31, %v1319_v20  ;;  %v1182_v44 = vsub.f32 %v1150_v55, %v2314_v1  ;;  %v1278_v1 = vperm.slane %v2209_v23, %v2413_v29  ;;  %v1330_v31 = vperm.slane %v1205_v0, %v2447_v52 }
 0x1d3   : > { %v1323_v41 = vsel %vm1279_vm9, %v2551_v37, %v1321_v7  ;;  %v1109_v61 = vmul.f32 0.6931472, %v1674_v46  ;;  %1677 = vlog2.f32 %v1029_v38  ;;  %v1140_v39 = vadd.f32 %v1107_v48, %v2364_v34 }
 0x1d4   : > { %v1325_v15 = vsel %vm1283_vm10, %v2552_v35, %v1323_v41  ;;  %v1266_v54 = vperm.slane %v1182_v44, %v2455_v10  ;;  %v1189_v23 = vsub.f32 %v1157_v17, %v2274_v8  ;;  %v1282_v6 = vperm.slane %v2173_v59, %v2419_v11 }
 0x1d5   : > { %v1141_v24 = vadd.f32 %v1109_v61, %v2407_v58  ;;  %v1327_v36 = vsel %vm1287_vm11, %v2553_v60, %v1325_v15  ;;  %v1174_v59 = vsub.f32 %v1140_v39, %v2056_v12  ;;  %v1210_v55 = vstv %s210_s25 }
 0x1d6   : > { %v1676_v49 = vpop.eup %1675  ;;  %v1268_v10 = vsel %vm1267_vm6, %v1266_v54, %v2404_v28  ;;  %v1329_v32 = vsel %vm1291_vm12, %v1328_v27, %v1327_v36  ;;  %v1286_v28 = vperm.slane %v2282_v22, %v2432_v33  ;;  %v1294_v57 = vperm.slane %v1189_v23, %v2447_v52 }
 0x1d7   : > { %v1272_v29 = vsel %vm1271_vm7, %v1270_v18, %v1268_v10  ;;  %v1331_v58 = vsel %vm1295_vm13, %v1330_v31, %v1329_v32  ;;  %v1075_v50 = vmul.f32 0.6931472, %v1676_v49  ;;  %v1175_v8 = vsub.f32 %v1141_v24, %v2056_v12 }
 0x1d8   : > { %v1276_v34 = vsel %vm1275_vm8, %v2554_v5, %v1272_v29  ;;  %v1206_v3 = vsub.f32 %v1174_v59, %v2361_v53  ;;  %vm1211_vm1 = vcmp.lt.s32.totalorder %v2140_v63, %v1210_v55 }
 0x1d9   : > { %v1280_v27 = vsel %vm1279_vm9, %v1278_v1, %v1276_v34  ;;  %v1124_v26 = vadd.f32 %v1075_v50, %v2423_v47  ;;  %v1678_v42 = vpop.eup %1677  ;;  %v1301_v47 = vadd.s32 4294967176, %v2140_v63  ;;  %v1207_v45 = vsub.f32 %v1175_v8, %v2398_v51 }
 0x1da   : > { %v1284_v11 = vsel %vm1283_vm10, %v1282_v6, %v1280_v27  ;;  %v1077_v33 = vmul.f32 0.6931472, %v1678_v42  ;;  %v1332_v0 = vperm.slane %v1206_v3, %v1297_v40 }
 0x1db   : > { %v1288_v25 = vsel %vm1287_vm11, %v1286_v28, %v1284_v11  ;;  %v1158_v22 = vsub.f32 %v1124_v26, %v2056_v12  ;;  %v1334_v9 = vperm.slane %v1207_v45, %v1301_v47 }
 0x1dc   : > { %v1292_v2 = vsel %vm1291_vm12, %v1290_v16, %v1288_v25  ;;  %v1125_v52 = vadd.f32 %v1077_v33, %v2441_v56 }
 0x1dd   : > { %v1296_v4 = vsel %vm1295_vm13, %v1294_v57, %v1292_v2  ;;  %v1190_v21 = vsub.f32 %v1158_v22, %v2312_v14  ;;  %v1333_v14 = vsel %vm1299_vm14, %v1332_v0, %v1331_v58 }
 0x1de   : > { %v1159_v43 = vsub.f32 %v1125_v52, %v2056_v12  ;;  %v1335_v53 = vsel %vm1303_vm15, %v1334_v9, %v1333_v14 }
 0x1df   : > { %v1298_v62 = vperm.slane %v1190_v21, %v1297_v40 }
 0x1e0   : > { %v1191_v30 = vsub.f32 %v1159_v43, %v2400_v13 }
 0x1e1   : > { %v1300_v51 = vsel %vm1299_vm14, %v1298_v62, %v1296_v4 }
 0x1e2   : > { %v1302_v17 = vperm.slane %v1191_v30, %v1301_v47 }
 0x1e4   : > { %v1304_v12 = vsel %vm1303_vm15, %v1302_v17, %v1300_v51 }
 0x1e5   : > { %v1337_v56 = vsel %vm1336_vm0, %v1335_v53, %v1304_v12 }
 0x1e6   : > { %v1339_v20 = vsel %vm1211_vm1, %v1337_v56, 0.0 }
 0x1e7   : > { %1340 = vst [vmem:[%s209_s16] sm:$0x3] %v1339_v20 }
 0x1e8 PF: > { %s15_s15 = sadd.s32 1, %s1704_s15  }
 0x1e9   : > { %p12_p7 = scmp.ge.s32.totalorder %s15_s15, 14  }
 0x1eb   :  { %14 = sbr.rel (!%p12_p7) target bundleno = 1 (0x1), region = 72 }
 0x1f0   :  { %1360 = vsyncpa [#allocation3], 1 }
 0x1f1   :  { %1362 = vsyncpa [#allocation3 + $0x1], 1 }

</bundles_post_ra>
